<compile_context>
chip_gen: v7x
topology: tpu7x:2x2x1
jax: 0.10.0
libtpu: 0.0.40
codegen_flags: <defaults>
</compile_context>

<pallas_src>
import jax
import jax.numpy as jnp
from jax.experimental import pallas as pl
from jax.experimental.pallas import tpu as pltpu

LANE = 128     # TPU lane width  (last dim)
SUBLANE = 8    # TPU sublane width (second-to-last dim)


def _round_up(x, m):
    return (x + m - 1) // m * m


def _pad_to(a, axis, target):
    pad = [(0, 0)] * a.ndim
    pad[axis] = (0, target - a.shape[axis])
    return jnp.pad(a, pad)


# ----------------------------------------------------------------------------
# Fused TemporalBlock kernel
#   conv1(dilated,causal) -> ReLU -> conv2(dilated,causal) -> ReLU
#   -> (+ residual / 1x1 conv) -> ReLU   [-> Linear head, last block only]
# ----------------------------------------------------------------------------
def temporal_block_pallas(x, w1, b1, w2, b2, wd=None, bd=None,
                          wl=None, bl=None, *, k, d):
    """x: (B, T, Cin_p);  w1: (k, Cin_p, Cout_p);  w2: (k, Cout_p, Cout_p);
    b*: (1, Cout_p);  wd: (Cin_p, Cout_p) or None (identity residual);
    wl/bl: optional fused Linear head weights (Cout_p, Out_p)/(1, Out_p)."""
    B, T, cin_p = x.shape
    cout_p = w1.shape[-1]
    has_down = wd is not None
    has_head = wl is not None
    out_cols = wl.shape[-1] if has_head else cout_p
    assert has_down or cin_p == cout_p

    P = (k - 1) * d                     # Conv1d padding == Chomp1d chomp_size
    F = _round_up(max(P, 1), SUBLANE)   # aligned front zero rows of the slab
    Gb = _round_up(T + P, SUBLANE)      # rows per batch in the folded slab
    E = Gb - T                          # per-batch zero-prefix rows
    M = B * Gb                          # folded matmul M dimension
    # E >= P guarantees each valid output row only reads its own batch's
    # zero prefix (no cross-batch / stale-data contamination).
    assert E >= P and F >= P

    n_w = 4 + (2 if has_down else 0) + (2 if has_head else 0)

    def kernel(*refs):
        x_hbm = refs[0]
        w_refs = refs[1:1 + n_w]
        out_ref = refs[1 + n_w]
        xp_s, h1p_s, sem = refs[2 + n_w:]

        w1_ref, b1_ref, w2_ref, b2_ref = w_refs[:4]
        idx = 4
        if has_down:
            wd_ref, bd_ref = w_refs[idx], w_refs[idx + 1]
            idx += 2
        if has_head:
            wl_ref, bl_ref = w_refs[idx], w_refs[idx + 1]

        # 1) DMA each batch's rows straight from HBM into the slab's valid
        #    region: the scatter rides the DMA engine instead of vld/vst.
        copies = []
        for b in range(B):
            cp = pltpu.make_async_copy(
                x_hbm.at[b],
                xp_s.at[pl.ds(F + b * Gb + E, T), :],
                sem.at[b])
            cp.start()
            copies.append(cp)

        # 2) While the DMAs fly, zero ONLY the causal-pad rows (front F rows
        #    + per-batch E-row prefix strips).  Padded lane columns never
        #    need zeroing: the padded weight rows are already zero.
        xp_s[pl.ds(0, F), :] = jnp.zeros((F, cin_p), xp_s.dtype)
        for b in range(B):
            xp_s[pl.ds(F + b * Gb, E), :] = jnp.zeros((E, cin_p), xp_s.dtype)

        for cp in copies:
            cp.wait()

        # 3) conv1 over the whole folded slab: k dilated taps == k shifted
        #    (M, Cin) @ (Cin, Cout) MXU matmuls, accumulated as a chained f32
        #    value (no accumulator scratch, no extra RMW passes); bias + ReLU
        #    fused into the single store into the h1 slab.
        acc = jnp.dot(xp_s[pl.ds(F - P, M), :], w1_ref[0],
                      preferred_element_type=jnp.float32)
        for j in range(1, k):
            acc = acc + jnp.dot(xp_s[pl.ds(F - P + j * d, M), :], w1_ref[j],
                                preferred_element_type=jnp.float32)
        h1p_s[pl.ds(F, M), :] = jnp.maximum(
            acc + b1_ref[...], 0.0).astype(h1p_s.dtype)

        # conv1 wrote garbage onto the dead prefix rows; re-zero only those
        # strips so conv2's causal reads see zeros.
        for b in range(B):
            h1p_s[pl.ds(F + b * Gb, E), :] = jnp.zeros((E, cout_p),
                                                       h1p_s.dtype)

        # 4) conv2 + residual + final ReLU (+ optional Linear head) per
        #    batch: only valid rows are matmul'd / stored, and no full
        #    (M, Cout) epilogue value is ever materialized.
        for b in range(B):
            base = F + b * Gb + E
            acc2 = jnp.dot(h1p_s[pl.ds(base - P, T), :], w2_ref[0],
                           preferred_element_type=jnp.float32)
            for j in range(1, k):
                acc2 = acc2 + jnp.dot(h1p_s[pl.ds(base - P + j * d, T), :],
                                      w2_ref[j],
                                      preferred_element_type=jnp.float32)
            h2 = jnp.maximum(acc2 + b2_ref[...], 0.0)

            xin = xp_s[pl.ds(base, T), :]
            if has_down:
                res = jnp.dot(xin, wd_ref[...],
                              preferred_element_type=jnp.float32) + bd_ref[...]
            else:
                res = xin.astype(jnp.float32)
            blk_out = jnp.maximum(h2 + res, 0.0)

            if has_head:
                y = jnp.dot(blk_out.astype(wl_ref.dtype), wl_ref[...],
                            preferred_element_type=jnp.float32) + bl_ref[...]
                out_ref[b] = y.astype(out_ref.dtype)
            else:
                out_ref[b] = blk_out.astype(out_ref.dtype)

    args = [x, w1, b1, w2, b2]
    in_specs = [
        pl.BlockSpec(memory_space=pl.ANY),                      # x stays in HBM
        pl.BlockSpec((k, cin_p, cout_p), lambda i: (0, 0, 0)),
        pl.BlockSpec((1, cout_p), lambda i: (0, 0)),
        pl.BlockSpec((k, cout_p, cout_p), lambda i: (0, 0, 0)),
        pl.BlockSpec((1, cout_p), lambda i: (0, 0)),
    ]
    if has_down:
        args += [wd, bd]
        in_specs += [pl.BlockSpec((cin_p, cout_p), lambda i: (0, 0)),
                     pl.BlockSpec((1, cout_p), lambda i: (0, 0))]
    if has_head:
        args += [wl, bl]
        in_specs += [pl.BlockSpec((cout_p, out_cols), lambda i: (0, 0)),
                     pl.BlockSpec((1, out_cols), lambda i: (0, 0))]

    # VMEM budget from the actual footprint (two slabs + conservatively
    # double-buffered weight/bias/output blocks + headroom), clamped to stay
    # inside every generation's physical VMEM (v7x: 64 MiB).
    act_item = jnp.dtype(x.dtype).itemsize
    w_item = jnp.dtype(w1.dtype).itemsize
    slab_bytes = (F + M) * (cin_p + cout_p) * act_item
    w_bytes = (k * cin_p * cout_p + k * cout_p * cout_p
               + (cin_p * cout_p if has_down else 0)
               + (cout_p * out_cols if has_head else 0)
               + 2 * cout_p + 2 * out_cols) * w_item
    out_bytes = B * T * out_cols * act_item
    vmem_limit = int(min(64 * 2 ** 20,
                         max(16 * 2 ** 20,
                             2 * (slab_bytes + 2 * w_bytes + 2 * out_bytes))))

    return pl.pallas_call(
        kernel,
        out_shape=jax.ShapeDtypeStruct((B, T, out_cols), x.dtype),
        grid_spec=pltpu.PrefetchScalarGridSpec(
            num_scalar_prefetch=0,
            grid=(1,),
            in_specs=in_specs,
            out_specs=pl.BlockSpec((B, T, out_cols), lambda i: (0, 0, 0)),
            scratch_shapes=[
                pltpu.VMEM((F + M, cin_p), x.dtype),    # causal-padded x slab
                pltpu.VMEM((F + M, cout_p), x.dtype),   # causal-padded h1 slab
                pltpu.SemaphoreType.DMA((B,)),          # per-batch input DMA
            ]),
        compiler_params=pltpu.CompilerParams(
            dimension_semantics=("arbitrary",),
            vmem_limit_bytes=vmem_limit),
    )(*args)


# ----------------------------------------------------------------------------
# Plain-JAX glue: weight_norm, one-time weight prep, network composition
# ----------------------------------------------------------------------------
def weight_norm_weight(v, g):
    # v: (Cout, Cin, k), g: (Cout,) -> g * v / ||v||_(Cin,k)   (PyTorch dim=0)
    norm = jnp.sqrt(jnp.sum(v * v, axis=(1, 2), keepdims=True))
    return v * (g[:, None, None] / norm)


def conv_weight_to_taps_padded(w, cin_p, cout_p):
    # PyTorch Conv1d weight (Cout, Cin, k) -> (k, Cin_p, Cout_p), zero padded.
    t = jnp.transpose(w, (2, 1, 0))
    t = _pad_to(t, 1, cin_p)
    t = _pad_to(t, 2, cout_p)
    return t


def prepare_params(params, input_size):
    """weight_norm + transpose + lane padding, run ONCE outside the jit."""
    prep = {"blocks": []}
    cin_p = _round_up(input_size, LANE)
    for p in params["blocks"]:
        out_ch = p["v1"].shape[0]
        cout_p = _round_up(out_ch, LANE)
        blk = {
            "w1": conv_weight_to_taps_padded(
                weight_norm_weight(p["v1"], p["g1"]), cin_p, cout_p),
            "b1": _pad_to(p["b1"], 1, cout_p),
            "w2": conv_weight_to_taps_padded(
                weight_norm_weight(p["v2"], p["g2"]), cout_p, cout_p),
            "b2": _pad_to(p["b2"], 1, cout_p),
        }
        if "wd" in p:
            blk["wd"] = conv_weight_to_taps_padded(p["wd"], cin_p, cout_p)[0]
            blk["bd"] = _pad_to(p["bd"], 1, cout_p)
        prep["blocks"].append(blk)
        cin_p = cout_p
    out_size = params["lin_w"].shape[0]
    out_p = _round_up(out_size, LANE)
    prep["lin_w"] = _pad_to(_pad_to(jnp.transpose(params["lin_w"]), 0, cin_p),
                            1, out_p)
    prep["lin_b"] = _pad_to(params["lin_b"], 1, out_p)
    return jax.tree_util.tree_map(jnp.asarray, prep)


def tcn_forward(x, prep, channel_last=True):
    # PyTorch: tcn(x.transpose(1,2)) then linear(y1.transpose(1,2)); in our
    # (B, T, C) layout both transposes are identity when channel_last.
    h = x if channel_last else jnp.transpose(x, (0, 2, 1))
    cin_p = prep["blocks"][0]["w1"].shape[1]
    h = _pad_to(h, 2, cin_p)          # one-time zero lane-pad of the input

    n = len(prep["blocks"])
    for i, p in enumerate(prep["blocks"]):
        last = (i == n - 1)
        h = temporal_block_pallas(
            h, p["w1"], p["b1"], p["w2"], p["b2"],
            p.get("wd"), p.get("bd"),
            wl=prep["lin_w"] if last else None,
            bl=prep["lin_b"] if last else None,
            k=p["w1"].shape[0], d=2 ** i)
    return h                           # (B, T, Out_p) — lane-padded head out


def init_params(key, input_size, output_size, num_channels, kernel_size):
    params = {"blocks": []}
    for i, out_ch in enumerate(num_channels):
        in_ch = input_size if i == 0 else num_channels[i - 1]
        key, k1, k2, k3, k4, k5, k6 = jax.random.split(key, 7)
        v1 = 0.01 * jax.random.normal(k1, (out_ch, in_ch, kernel_size), jnp.float32)
        v2 = 0.01 * jax.random.normal(k2, (out_ch, out_ch, kernel_size), jnp.float32)
        bound1 = 1.0 / jnp.sqrt(in_ch * kernel_size)
        bound2 = 1.0 / jnp.sqrt(out_ch * kernel_size)
        p = {
            "v1": v1,
            "g1": jnp.sqrt(jnp.sum(v1 * v1, axis=(1, 2))),   # weight_norm init
            "b1": jax.random.uniform(k3, (1, out_ch), jnp.float32, -bound1, bound1),
            "v2": v2,
            "g2": jnp.sqrt(jnp.sum(v2 * v2, axis=(1, 2))),
            "b2": jax.random.uniform(k4, (1, out_ch), jnp.float32, -bound2, bound2),
        }
        if in_ch != out_ch:
            p["wd"] = 0.01 * jax.random.normal(k5, (out_ch, in_ch, 1), jnp.float32)
            bd_bound = 1.0 / jnp.sqrt(in_ch)
            p["bd"] = jax.random.uniform(k6, (1, out_ch), jnp.float32,
                                         -bd_bound, bd_bound)
        params["blocks"].append(p)

    key, kw, kb = jax.random.split(key, 3)
    c_last = num_channels[-1]
    params["lin_w"] = 0.01 * jax.random.normal(kw, (output_size, c_last), jnp.float32)
    lb = 1.0 / jnp.sqrt(c_last)
    params["lin_b"] = jax.random.uniform(kb, (1, output_size), jnp.float32, -lb, lb)
    return params


# ----------------------------------------------------------------------------
# Pure-JAX reference (direct translation of the PyTorch semantics)
# ----------------------------------------------------------------------------
def _ref_causal_conv(x, w, b, d):
    # x: (B, T, Cin); w: (Cout, Cin, k); b: (Cout,)   == Conv1d(pad)+Chomp1d
    k = w.shape[-1]
    pad = (k - 1) * d
    xp = jnp.pad(x, ((0, 0), (pad, 0), (0, 0)))
    T = x.shape[1]
    y = jnp.zeros((x.shape[0], T, w.shape[0]), jnp.float32) + b[None, None, :]
    for j in range(k):
        y = y + jnp.einsum("btc,oc->bto", xp[:, j * d:j * d + T, :], w[:, :, j])
    return y


def _ref_block(x, p, k, d):
    w1 = weight_norm_weight(p["v1"], p["g1"])
    w2 = weight_norm_weight(p["v2"], p["g2"])
    h1 = jax.nn.relu(_ref_causal_conv(x, w1, p["b1"][0], d))
    h2 = jax.nn.relu(_ref_causal_conv(h1, w2, p["b2"][0], d))
    res = _ref_causal_conv(x, p["wd"], p["bd"][0], 1) if "wd" in p else x
    return jax.nn.relu(h2 + res)


def tcn_forward_ref(x, params, kernel_size):
    h = x
    for i, p in enumerate(params["blocks"]):
        h = _ref_block(h, p, kernel_size, 2 ** i)
    return h @ params["lin_w"].T + params["lin_b"]


# ----------------------------------------------------------------------------
if __name__ == "__main__":
    B, T = 2, 16
    input_size, output_size = 8, 8
    num_channels = [16, 16]
    kernel_size = 2

    key = jax.random.PRNGKey(0)
    key, kx = jax.random.split(key)
    x = jax.random.normal(kx, (B, T, input_size), jnp.float32)  # (B, T, C)

    params = init_params(key, input_size, output_size, num_channels, kernel_size)
    prep = prepare_params(params, input_size)        # one-time, outside jit

    fwd = jax.jit(tcn_forward)
    y_padded = fwd(x, prep)
    jax.block_until_ready(y_padded)
    y = y_padded[..., :output_size]
    assert y.shape == (B, T, output_size), y.shape

    y_ref = tcn_forward_ref(x, params, kernel_size)
    err = float(jnp.max(jnp.abs(y - y_ref)))
    # jnp.dot default precision uses reduced-precision MXU passes for f32
    # inputs; tolerance below accounts for that (pass Precision.HIGHEST for
    # closer parity at ~3x MXU cost).
    assert jnp.allclose(y, y_ref, atol=1e-3, rtol=1e-2), err

    print("KERNEL_OK")
</pallas_src>

<mosaic_0001>
module attributes {stable_mosaic.version = 11 : i64} {
  func.func @kernel(%arg0: i32, %arg1: memref<2x16x128xf32, #tpu.memory_space<any>>, %arg2: memref<2x128x128xf32, #tpu.memory_space<vmem>>, %arg3: memref<1x128xf32, #tpu.memory_space<vmem>>, %arg4: memref<2x128x128xf32, #tpu.memory_space<vmem>>, %arg5: memref<1x128xf32, #tpu.memory_space<vmem>>, %arg6: memref<128x128xf32, #tpu.memory_space<vmem>>, %arg7: memref<1x128xf32, #tpu.memory_space<vmem>>, %arg8: memref<2x16x128xf32, #tpu.memory_space<vmem>>, %arg9: memref<56x128xf32, #tpu.memory_space<vmem>>, %arg10: memref<56x128xf32, #tpu.memory_space<vmem>>, %arg11: memref<2x!tpu.dma_semaphore, #tpu.memory_space<semaphore_mem>>) attributes {dimension_semantics = [#tpu.dimension_semantics<arbitrary>], iteration_bounds = array<i64: 1>, scalar_prefetch = 0 : i64, scratch_operands = 3 : i64, tpu.core_type = #tpu.core_type<tc>, window_params = [{}, {pipeline_mode = #tpu.pipeline_mode<synchronous>, transform_indices = @transform_1, window_bounds = array<i64: 2, 128, 128>}, {pipeline_mode = #tpu.pipeline_mode<synchronous>, transform_indices = @transform_2, window_bounds = array<i64: 1, 128>}, {pipeline_mode = #tpu.pipeline_mode<synchronous>, transform_indices = @transform_3, window_bounds = array<i64: 2, 128, 128>}, {pipeline_mode = #tpu.pipeline_mode<synchronous>, transform_indices = @transform_4, window_bounds = array<i64: 1, 128>}, {pipeline_mode = #tpu.pipeline_mode<synchronous>, transform_indices = @transform_5, window_bounds = array<i64: 128, 128>}, {pipeline_mode = #tpu.pipeline_mode<synchronous>, transform_indices = @transform_6, window_bounds = array<i64: 1, 128>}, {pipeline_mode = #tpu.pipeline_mode<synchronous>, transform_indices = @transform_7, window_bounds = array<i64: 2, 16, 128>}]} {
    %c0_i32 = arith.constant 0 : i32
    %c0_i32_0 = arith.constant 0 : i32
    %c0_i32_1 = arith.constant 0 : i32
    %c0_i32_2 = arith.constant 0 : i32
    %0 = tpu.memref_slice %arg1[%c0_i32, %c0_i32_1, %c0_i32_2] : memref<2x16x128xf32, #tpu.memory_space<any>> -> memref<1x16x128xf32, #tpu.memory_space<any>>
    %1 = tpu.memref_squeeze %0 : memref<1x16x128xf32, #tpu.memory_space<any>> -> memref<16x128xf32, #tpu.memory_space<any>>
    %c16_i32 = arith.constant 16 : i32
    %c0_i32_3 = arith.constant 0 : i32
    %2 = tpu.memref_slice %arg9[%c16_i32, %c0_i32_3] : memref<56x128xf32, #tpu.memory_space<vmem>> -> memref<16x128xf32, #tpu.memory_space<vmem>>
    %3 = tpu.memref_slice %arg11[%c0_i32_0] : memref<2x!tpu.dma_semaphore, #tpu.memory_space<semaphore_mem>> -> memref<1x!tpu.dma_semaphore, #tpu.memory_space<semaphore_mem>>
    %4 = tpu.memref_squeeze %3 : memref<1x!tpu.dma_semaphore, #tpu.memory_space<semaphore_mem>> -> memref<!tpu.dma_semaphore, #tpu.memory_space<semaphore_mem>>
    tpu.enqueue_dma source(%1 : memref<16x128xf32, #tpu.memory_space<any>>) target(%2 : memref<16x128xf32, #tpu.memory_space<vmem>>) target_semaphore(%4 : memref<!tpu.dma_semaphore, #tpu.memory_space<semaphore_mem>>)
    %c1_i32 = arith.constant 1 : i32
    %c1_i32_4 = arith.constant 1 : i32
    %c0_i32_5 = arith.constant 0 : i32
    %c0_i32_6 = arith.constant 0 : i32
    %5 = tpu.memref_slice %arg1[%c1_i32, %c0_i32_5, %c0_i32_6] : memref<2x16x128xf32, #tpu.memory_space<any>> -> memref<1x16x128xf32, #tpu.memory_space<any>>
    %6 = tpu.memref_squeeze %5 : memref<1x16x128xf32, #tpu.memory_space<any>> -> memref<16x128xf32, #tpu.memory_space<any>>
    %c40_i32 = arith.constant 40 : i32
    %c0_i32_7 = arith.constant 0 : i32
    %7 = tpu.memref_slice %arg9[%c40_i32, %c0_i32_7] : memref<56x128xf32, #tpu.memory_space<vmem>> -> memref<16x128xf32, #tpu.memory_space<vmem>>
    %8 = tpu.memref_slice %arg11[%c1_i32_4] : memref<2x!tpu.dma_semaphore, #tpu.memory_space<semaphore_mem>> -> memref<1x!tpu.dma_semaphore, #tpu.memory_space<semaphore_mem>>
    %9 = tpu.memref_squeeze %8 : memref<1x!tpu.dma_semaphore, #tpu.memory_space<semaphore_mem>> -> memref<!tpu.dma_semaphore, #tpu.memory_space<semaphore_mem>>
    tpu.enqueue_dma source(%6 : memref<16x128xf32, #tpu.memory_space<any>>) target(%7 : memref<16x128xf32, #tpu.memory_space<vmem>>) target_semaphore(%9 : memref<!tpu.dma_semaphore, #tpu.memory_space<semaphore_mem>>)
    %cst = arith.constant 0.000000e+00 : f32
    %10 = vector.broadcast %cst : f32 to vector<8x128xf32>
    %c0 = arith.constant 0 : index
    %c0_8 = arith.constant 0 : index
    %11 = vector.load %arg9[%c0, %c0_8] : memref<56x128xf32, #tpu.memory_space<vmem>>, vector<8x128xf32>
    tpu.vector_store %arg9[%c0, %c0_8], %10 {strides = array<i32>} : memref<56x128xf32, #tpu.memory_space<vmem>>, vector<8x128xf32>,
    %cst_9 = arith.constant 0.000000e+00 : f32
    %12 = vector.broadcast %cst_9 : f32 to vector<8x128xf32>
    %c8 = arith.constant 8 : index
    %c0_10 = arith.constant 0 : index
    %13 = vector.load %arg9[%c8, %c0_10] : memref<56x128xf32, #tpu.memory_space<vmem>>, vector<8x128xf32>
    tpu.vector_store %arg9[%c8, %c0_10], %12 {strides = array<i32>} : memref<56x128xf32, #tpu.memory_space<vmem>>, vector<8x128xf32>,
    %cst_11 = arith.constant 0.000000e+00 : f32
    %14 = vector.broadcast %cst_11 : f32 to vector<8x128xf32>
    %c32 = arith.constant 32 : index
    %c0_12 = arith.constant 0 : index
    %15 = vector.load %arg9[%c32, %c0_12] : memref<56x128xf32, #tpu.memory_space<vmem>>, vector<8x128xf32>
    tpu.vector_store %arg9[%c32, %c0_12], %14 {strides = array<i32>} : memref<56x128xf32, #tpu.memory_space<vmem>>, vector<8x128xf32>,
    %c0_i32_13 = arith.constant 0 : i32
    %c0_i32_14 = arith.constant 0 : i32
    %c0_i32_15 = arith.constant 0 : i32
    %c0_i32_16 = arith.constant 0 : i32
    %16 = tpu.memref_slice %arg1[%c0_i32_13, %c0_i32_15, %c0_i32_16] : memref<2x16x128xf32, #tpu.memory_space<any>> -> memref<1x16x128xf32, #tpu.memory_space<any>>
    %17 = tpu.memref_squeeze %16 : memref<1x16x128xf32, #tpu.memory_space<any>> -> memref<16x128xf32, #tpu.memory_space<any>>
    %c16_i32_17 = arith.constant 16 : i32
    %c0_i32_18 = arith.constant 0 : i32
    %18 = tpu.memref_slice %arg9[%c16_i32_17, %c0_i32_18] : memref<56x128xf32, #tpu.memory_space<vmem>> -> memref<16x128xf32, #tpu.memory_space<vmem>>
    %19 = tpu.memref_slice %arg11[%c0_i32_14] : memref<2x!tpu.dma_semaphore, #tpu.memory_space<semaphore_mem>> -> memref<1x!tpu.dma_semaphore, #tpu.memory_space<semaphore_mem>>
    %20 = tpu.memref_squeeze %19 : memref<1x!tpu.dma_semaphore, #tpu.memory_space<semaphore_mem>> -> memref<!tpu.dma_semaphore, #tpu.memory_space<semaphore_mem>>
    tpu.wait_dma2 semaphore(%20 : memref<!tpu.dma_semaphore, #tpu.memory_space<semaphore_mem>>) src(%17 : memref<16x128xf32, #tpu.memory_space<any>>) dst(%18 : memref<16x128xf32, #tpu.memory_space<vmem>>)
    %c1_i32_19 = arith.constant 1 : i32
    %c1_i32_20 = arith.constant 1 : i32
    %c0_i32_21 = arith.constant 0 : i32
    %c0_i32_22 = arith.constant 0 : i32
    %21 = tpu.memref_slice %arg1[%c1_i32_19, %c0_i32_21, %c0_i32_22] : memref<2x16x128xf32, #tpu.memory_space<any>> -> memref<1x16x128xf32, #tpu.memory_space<any>>
    %22 = tpu.memref_squeeze %21 : memref<1x16x128xf32, #tpu.memory_space<any>> -> memref<16x128xf32, #tpu.memory_space<any>>
    %c40_i32_23 = arith.constant 40 : i32
    %c0_i32_24 = arith.constant 0 : i32
    %23 = tpu.memref_slice %arg9[%c40_i32_23, %c0_i32_24] : memref<56x128xf32, #tpu.memory_space<vmem>> -> memref<16x128xf32, #tpu.memory_space<vmem>>
    %24 = tpu.memref_slice %arg11[%c1_i32_20] : memref<2x!tpu.dma_semaphore, #tpu.memory_space<semaphore_mem>> -> memref<1x!tpu.dma_semaphore, #tpu.memory_space<semaphore_mem>>
    %25 = tpu.memref_squeeze %24 : memref<1x!tpu.dma_semaphore, #tpu.memory_space<semaphore_mem>> -> memref<!tpu.dma_semaphore, #tpu.memory_space<semaphore_mem>>
    tpu.wait_dma2 semaphore(%25 : memref<!tpu.dma_semaphore, #tpu.memory_space<semaphore_mem>>) src(%22 : memref<16x128xf32, #tpu.memory_space<any>>) dst(%23 : memref<16x128xf32, #tpu.memory_space<vmem>>)
    %c7 = arith.constant 7 : index
    %c0_25 = arith.constant 0 : index
    %26 = vector.load %arg9[%c7, %c0_25] : memref<56x128xf32, #tpu.memory_space<vmem>>, vector<48x128xf32>
    %c0_26 = arith.constant 0 : index
    %c0_27 = arith.constant 0 : index
    %c0_28 = arith.constant 0 : index
    %27 = vector.load %arg2[%c0_26, %c0_27, %c0_28] : memref<2x128x128xf32, #tpu.memory_space<vmem>>, vector<1x128x128xf32>
    %28 = vector.shape_cast %27 : vector<1x128x128xf32> to vector<128x128xf32>
    %cst_29 = arith.constant dense<0.000000e+00> : vector<48x128xf32>
    %29 = tpu.matmul %26, %28, %cst_29 {dimension_numbers = #tpu.dot_dimension_numbers<[1], [0], [0], [1], [0, 0, 1, 1], [], []>} : vector<48x128xf32>, vector<128x128xf32>, vector<48x128xf32> -> vector<48x128xf32>
    %c8_30 = arith.constant 8 : index
    %c0_31 = arith.constant 0 : index
    %30 = vector.load %arg9[%c8_30, %c0_31] : memref<56x128xf32, #tpu.memory_space<vmem>>, vector<48x128xf32>
    %c1 = arith.constant 1 : index
    %c0_32 = arith.constant 0 : index
    %c0_33 = arith.constant 0 : index
    %31 = vector.load %arg2[%c1, %c0_32, %c0_33] : memref<2x128x128xf32, #tpu.memory_space<vmem>>, vector<1x128x128xf32>
    %32 = vector.shape_cast %31 : vector<1x128x128xf32> to vector<128x128xf32>
    %cst_34 = arith.constant dense<0.000000e+00> : vector<48x128xf32>
    %33 = tpu.matmul %30, %32, %cst_34 {dimension_numbers = #tpu.dot_dimension_numbers<[1], [0], [0], [1], [0, 0, 1, 1], [], []>} : vector<48x128xf32>, vector<128x128xf32>, vector<48x128xf32> -> vector<48x128xf32>
    %34 = arith.addf %29, %33 : vector<48x128xf32>
    %c0_35 = arith.constant 0 : index
    %c0_36 = arith.constant 0 : index
    %35 = vector.load %arg3[%c0_35, %c0_36] : memref<1x128xf32, #tpu.memory_space<vmem>>, vector<1x128xf32>
    %36 = vector.broadcast %35 : vector<1x128xf32> to vector<48x128xf32>
    %37 = arith.addf %34, %36 : vector<48x128xf32>
    %cst_37 = arith.constant 0.000000e+00 : f32
    %38 = vector.broadcast %cst_37 : f32 to vector<48x128xf32>
    %39 = arith.maximumf %37, %38 : vector<48x128xf32>
    %c8_38 = arith.constant 8 : index
    %c0_39 = arith.constant 0 : index
    %40 = vector.load %arg10[%c8_38, %c0_39] : memref<56x128xf32, #tpu.memory_space<vmem>>, vector<48x128xf32>
    tpu.vector_store %arg10[%c8_38, %c0_39], %39 {strides = array<i32>} : memref<56x128xf32, #tpu.memory_space<vmem>>, vector<48x128xf32>,
    %cst_40 = arith.constant 0.000000e+00 : f32
    %41 = vector.broadcast %cst_40 : f32 to vector<8x128xf32>
    %c8_41 = arith.constant 8 : index
    %c0_42 = arith.constant 0 : index
    %42 = vector.load %arg10[%c8_41, %c0_42] : memref<56x128xf32, #tpu.memory_space<vmem>>, vector<8x128xf32>
    tpu.vector_store %arg10[%c8_41, %c0_42], %41 {strides = array<i32>} : memref<56x128xf32, #tpu.memory_space<vmem>>, vector<8x128xf32>,
    %cst_43 = arith.constant 0.000000e+00 : f32
    %43 = vector.broadcast %cst_43 : f32 to vector<8x128xf32>
    %c32_44 = arith.constant 32 : index
    %c0_45 = arith.constant 0 : index
    %44 = vector.load %arg10[%c32_44, %c0_45] : memref<56x128xf32, #tpu.memory_space<vmem>>, vector<8x128xf32>
    tpu.vector_store %arg10[%c32_44, %c0_45], %43 {strides = array<i32>} : memref<56x128xf32, #tpu.memory_space<vmem>>, vector<8x128xf32>,
    %c15 = arith.constant 15 : index
    %c0_46 = arith.constant 0 : index
    %45 = vector.load %arg10[%c15, %c0_46] : memref<56x128xf32, #tpu.memory_space<vmem>>, vector<16x128xf32>
    %c0_47 = arith.constant 0 : index
    %c0_48 = arith.constant 0 : index
    %c0_49 = arith.constant 0 : index
    %46 = vector.load %arg4[%c0_47, %c0_48, %c0_49] : memref<2x128x128xf32, #tpu.memory_space<vmem>>, vector<1x128x128xf32>
    %47 = vector.shape_cast %46 : vector<1x128x128xf32> to vector<128x128xf32>
    %cst_50 = arith.constant dense<0.000000e+00> : vector<16x128xf32>
    %48 = tpu.matmul %45, %47, %cst_50 {dimension_numbers = #tpu.dot_dimension_numbers<[1], [0], [0], [1], [0, 0, 1, 1], [], []>} : vector<16x128xf32>, vector<128x128xf32>, vector<16x128xf32> -> vector<16x128xf32>
    %c16 = arith.constant 16 : index
    %c0_51 = arith.constant 0 : index
    %49 = vector.load %arg10[%c16, %c0_51] : memref<56x128xf32, #tpu.memory_space<vmem>>, vector<16x128xf32>
    %c1_52 = arith.constant 1 : index
    %c0_53 = arith.constant 0 : index
    %c0_54 = arith.constant 0 : index
    %50 = vector.load %arg4[%c1_52, %c0_53, %c0_54] : memref<2x128x128xf32, #tpu.memory_space<vmem>>, vector<1x128x128xf32>
    %51 = vector.shape_cast %50 : vector<1x128x128xf32> to vector<128x128xf32>
    %cst_55 = arith.constant dense<0.000000e+00> : vector<16x128xf32>
    %52 = tpu.matmul %49, %51, %cst_55 {dimension_numbers = #tpu.dot_dimension_numbers<[1], [0], [0], [1], [0, 0, 1, 1], [], []>} : vector<16x128xf32>, vector<128x128xf32>, vector<16x128xf32> -> vector<16x128xf32>
    %53 = arith.addf %48, %52 : vector<16x128xf32>
    %c0_56 = arith.constant 0 : index
    %c0_57 = arith.constant 0 : index
    %54 = vector.load %arg5[%c0_56, %c0_57] : memref<1x128xf32, #tpu.memory_space<vmem>>, vector<1x128xf32>
    %55 = vector.broadcast %54 : vector<1x128xf32> to vector<16x128xf32>
    %56 = arith.addf %53, %55 : vector<16x128xf32>
    %cst_58 = arith.constant 0.000000e+00 : f32
    %57 = vector.broadcast %cst_58 : f32 to vector<16x128xf32>
    %58 = arith.maximumf %56, %57 : vector<16x128xf32>
    %c16_59 = arith.constant 16 : index
    %c0_60 = arith.constant 0 : index
    %59 = vector.load %arg9[%c16_59, %c0_60] : memref<56x128xf32, #tpu.memory_space<vmem>>, vector<16x128xf32>
    %c0_61 = arith.constant 0 : index
    %c0_62 = arith.constant 0 : index
    %60 = vector.load %arg6[%c0_61, %c0_62] : memref<128x128xf32, #tpu.memory_space<vmem>>, vector<128x128xf32>
    %cst_63 = arith.constant dense<0.000000e+00> : vector<16x128xf32>
    %61 = tpu.matmul %59, %60, %cst_63 {dimension_numbers = #tpu.dot_dimension_numbers<[1], [0], [0], [1], [0, 0, 1, 1], [], []>} : vector<16x128xf32>, vector<128x128xf32>, vector<16x128xf32> -> vector<16x128xf32>
    %c0_64 = arith.constant 0 : index
    %c0_65 = arith.constant 0 : index
    %62 = vector.load %arg7[%c0_64, %c0_65] : memref<1x128xf32, #tpu.memory_space<vmem>>, vector<1x128xf32>
    %63 = vector.broadcast %62 : vector<1x128xf32> to vector<16x128xf32>
    %64 = arith.addf %61, %63 : vector<16x128xf32>
    %65 = arith.addf %58, %64 : vector<16x128xf32>
    %cst_66 = arith.constant 0.000000e+00 : f32
    %66 = vector.broadcast %cst_66 : f32 to vector<16x128xf32>
    %67 = arith.maximumf %65, %66 : vector<16x128xf32>
    %c0_67 = arith.constant 0 : index
    %c0_68 = arith.constant 0 : index
    %c0_69 = arith.constant 0 : index
    %68 = vector.load %arg8[%c0_67, %c0_68, %c0_69] : memref<2x16x128xf32, #tpu.memory_space<vmem>>, vector<1x16x128xf32>
    %69 = vector.shape_cast %68 : vector<1x16x128xf32> to vector<16x128xf32>
    %70 = vector.shape_cast %67 : vector<16x128xf32> to vector<1x16x128xf32>
    tpu.vector_store %arg8[%c0_67, %c0_68, %c0_69], %70 {strides = array<i32>} : memref<2x16x128xf32, #tpu.memory_space<vmem>>, vector<1x16x128xf32>,
    %c39 = arith.constant 39 : index
    %c0_70 = arith.constant 0 : index
    %71 = vector.load %arg10[%c39, %c0_70] : memref<56x128xf32, #tpu.memory_space<vmem>>, vector<16x128xf32>
    %c0_71 = arith.constant 0 : index
    %c0_72 = arith.constant 0 : index
    %c0_73 = arith.constant 0 : index
    %72 = vector.load %arg4[%c0_71, %c0_72, %c0_73] : memref<2x128x128xf32, #tpu.memory_space<vmem>>, vector<1x128x128xf32>
    %73 = vector.shape_cast %72 : vector<1x128x128xf32> to vector<128x128xf32>
    %cst_74 = arith.constant dense<0.000000e+00> : vector<16x128xf32>
    %74 = tpu.matmul %71, %73, %cst_74 {dimension_numbers = #tpu.dot_dimension_numbers<[1], [0], [0], [1], [0, 0, 1, 1], [], []>} : vector<16x128xf32>, vector<128x128xf32>, vector<16x128xf32> -> vector<16x128xf32>
    %c40 = arith.constant 40 : index
    %c0_75 = arith.constant 0 : index
    %75 = vector.load %arg10[%c40, %c0_75] : memref<56x128xf32, #tpu.memory_space<vmem>>, vector<16x128xf32>
    %c1_76 = arith.constant 1 : index
    %c0_77 = arith.constant 0 : index
    %c0_78 = arith.constant 0 : index
    %76 = vector.load %arg4[%c1_76, %c0_77, %c0_78] : memref<2x128x128xf32, #tpu.memory_space<vmem>>, vector<1x128x128xf32>
    %77 = vector.shape_cast %76 : vector<1x128x128xf32> to vector<128x128xf32>
    %cst_79 = arith.constant dense<0.000000e+00> : vector<16x128xf32>
    %78 = tpu.matmul %75, %77, %cst_79 {dimension_numbers = #tpu.dot_dimension_numbers<[1], [0], [0], [1], [0, 0, 1, 1], [], []>} : vector<16x128xf32>, vector<128x128xf32>, vector<16x128xf32> -> vector<16x128xf32>
    %79 = arith.addf %74, %78 : vector<16x128xf32>
    %c0_80 = arith.constant 0 : index
    %c0_81 = arith.constant 0 : index
    %80 = vector.load %arg5[%c0_80, %c0_81] : memref<1x128xf32, #tpu.memory_space<vmem>>, vector<1x128xf32>
    %81 = vector.broadcast %80 : vector<1x128xf32> to vector<16x128xf32>
    %82 = arith.addf %79, %81 : vector<16x128xf32>
    %cst_82 = arith.constant 0.000000e+00 : f32
    %83 = vector.broadcast %cst_82 : f32 to vector<16x128xf32>
    %84 = arith.maximumf %82, %83 : vector<16x128xf32>
    %c40_83 = arith.constant 40 : index
    %c0_84 = arith.constant 0 : index
    %85 = vector.load %arg9[%c40_83, %c0_84] : memref<56x128xf32, #tpu.memory_space<vmem>>, vector<16x128xf32>
    %c0_85 = arith.constant 0 : index
    %c0_86 = arith.constant 0 : index
    %86 = vector.load %arg6[%c0_85, %c0_86] : memref<128x128xf32, #tpu.memory_space<vmem>>, vector<128x128xf32>
    %cst_87 = arith.constant dense<0.000000e+00> : vector<16x128xf32>
    %87 = tpu.matmul %85, %86, %cst_87 {dimension_numbers = #tpu.dot_dimension_numbers<[1], [0], [0], [1], [0, 0, 1, 1], [], []>} : vector<16x128xf32>, vector<128x128xf32>, vector<16x128xf32> -> vector<16x128xf32>
    %c0_88 = arith.constant 0 : index
    %c0_89 = arith.constant 0 : index
    %88 = vector.load %arg7[%c0_88, %c0_89] : memref<1x128xf32, #tpu.memory_space<vmem>>, vector<1x128xf32>
    %89 = vector.broadcast %88 : vector<1x128xf32> to vector<16x128xf32>
    %90 = arith.addf %87, %89 : vector<16x128xf32>
    %91 = arith.addf %84, %90 : vector<16x128xf32>
    %cst_90 = arith.constant 0.000000e+00 : f32
    %92 = vector.broadcast %cst_90 : f32 to vector<16x128xf32>
    %93 = arith.maximumf %91, %92 : vector<16x128xf32>
    %c1_91 = arith.constant 1 : index
    %c0_92 = arith.constant 0 : index
    %c0_93 = arith.constant 0 : index
    %94 = vector.load %arg8[%c1_91, %c0_92, %c0_93] : memref<2x16x128xf32, #tpu.memory_space<vmem>>, vector<1x16x128xf32>
    %95 = vector.shape_cast %94 : vector<1x16x128xf32> to vector<16x128xf32>
    %96 = vector.shape_cast %93 : vector<16x128xf32> to vector<1x16x128xf32>
    tpu.vector_store %arg8[%c1_91, %c0_92, %c0_93], %96 {strides = array<i32>} : memref<2x16x128xf32, #tpu.memory_space<vmem>>, vector<1x16x128xf32>,
    return
  }
  func.func @transform_1(%arg0: i32) -> (i32, i32, i32) {
    %c0_i32 = arith.constant 0 : i32
    %c0_i32_0 = arith.constant 0 : i32
    %c0_i32_1 = arith.constant 0 : i32
    %c0_i32_2 = arith.constant 0 : i32
    return %c0_i32, %c0_i32_0, %c0_i32_1 : i32, i32, i32
  }
  func.func @transform_2(%arg0: i32) -> (i32, i32) {
    %c0_i32 = arith.constant 0 : i32
    %c0_i32_0 = arith.constant 0 : i32
    %c0_i32_1 = arith.constant 0 : i32
    return %c0_i32, %c0_i32_0 : i32, i32
  }
  func.func @transform_3(%arg0: i32) -> (i32, i32, i32) {
    %c0_i32 = arith.constant 0 : i32
    %c0_i32_0 = arith.constant 0 : i32
    %c0_i32_1 = arith.constant 0 : i32
    %c0_i32_2 = arith.constant 0 : i32
    return %c0_i32, %c0_i32_0, %c0_i32_1 : i32, i32, i32
  }
  func.func @transform_4(%arg0: i32) -> (i32, i32) {
    %c0_i32 = arith.constant 0 : i32
    %c0_i32_0 = arith.constant 0 : i32
    %c0_i32_1 = arith.constant 0 : i32
    return %c0_i32, %c0_i32_0 : i32, i32
  }
  func.func @transform_5(%arg0: i32) -> (i32, i32) {
    %c0_i32 = arith.constant 0 : i32
    %c0_i32_0 = arith.constant 0 : i32
    %c0_i32_1 = arith.constant 0 : i32
    return %c0_i32, %c0_i32_0 : i32, i32
  }
  func.func @transform_6(%arg0: i32) -> (i32, i32) {
    %c0_i32 = arith.constant 0 : i32
    %c0_i32_0 = arith.constant 0 : i32
    %c0_i32_1 = arith.constant 0 : i32
    return %c0_i32, %c0_i32_0 : i32, i32
  }
  func.func @transform_7(%arg0: i32) -> (i32, i32, i32) {
    %c0_i32 = arith.constant 0 : i32
    %c0_i32_0 = arith.constant 0 : i32
    %c0_i32_1 = arith.constant 0 : i32
    %c0_i32_2 = arith.constant 0 : i32
    return %c0_i32, %c0_i32_0, %c0_i32_1 : i32, i32, i32
  }
}

module attributes {stable_mosaic.version = 11 : i64} {
  func.func @kernel(%arg0: i32, %arg1: memref<2x16x128xf32, #tpu.memory_space<any>>, %arg2: memref<2x128x128xf32, #tpu.memory_space<vmem>>, %arg3: memref<1x128xf32, #tpu.memory_space<vmem>>, %arg4: memref<2x128x128xf32, #tpu.memory_space<vmem>>, %arg5: memref<1x128xf32, #tpu.memory_space<vmem>>, %arg6: memref<128x128xf32, #tpu.memory_space<vmem>>, %arg7: memref<1x128xf32, #tpu.memory_space<vmem>>, %arg8: memref<2x16x128xf32, #tpu.memory_space<vmem>>, %arg9: memref<56x128xf32, #tpu.memory_space<vmem>>, %arg10: memref<56x128xf32, #tpu.memory_space<vmem>>, %arg11: memref<2x!tpu.dma_semaphore, #tpu.memory_space<semaphore_mem>>) attributes {dimension_semantics = [#tpu.dimension_semantics<arbitrary>], iteration_bounds = array<i64: 1>, scalar_prefetch = 0 : i64, scratch_operands = 3 : i64, tpu.core_type = #tpu.core_type<tc>, window_params = [{}, {pipeline_mode = #tpu.pipeline_mode<synchronous>, transform_indices = @transform_1, window_bounds = array<i64: 2, 128, 128>}, {pipeline_mode = #tpu.pipeline_mode<synchronous>, transform_indices = @transform_2, window_bounds = array<i64: 1, 128>}, {pipeline_mode = #tpu.pipeline_mode<synchronous>, transform_indices = @transform_3, window_bounds = array<i64: 2, 128, 128>}, {pipeline_mode = #tpu.pipeline_mode<synchronous>, transform_indices = @transform_4, window_bounds = array<i64: 1, 128>}, {pipeline_mode = #tpu.pipeline_mode<synchronous>, transform_indices = @transform_5, window_bounds = array<i64: 128, 128>}, {pipeline_mode = #tpu.pipeline_mode<synchronous>, transform_indices = @transform_6, window_bounds = array<i64: 1, 128>}, {pipeline_mode = #tpu.pipeline_mode<synchronous>, transform_indices = @transform_7, window_bounds = array<i64: 2, 16, 128>}]} {
    %c0_i32 = arith.constant 0 : i32
    %c0_i32_0 = arith.constant 0 : i32
    %c0_i32_1 = arith.constant 0 : i32
    %c0_i32_2 = arith.constant 0 : i32
    %0 = tpu.memref_slice %arg1[%c0_i32, %c0_i32_1, %c0_i32_2] : memref<2x16x128xf32, #tpu.memory_space<any>> -> memref<1x16x128xf32, #tpu.memory_space<any>>
    %1 = tpu.memref_squeeze %0 : memref<1x16x128xf32, #tpu.memory_space<any>> -> memref<16x128xf32, #tpu.memory_space<any>>
    %c16_i32 = arith.constant 16 : i32
    %c0_i32_3 = arith.constant 0 : i32
    %2 = tpu.memref_slice %arg9[%c16_i32, %c0_i32_3] : memref<56x128xf32, #tpu.memory_space<vmem>> -> memref<16x128xf32, #tpu.memory_space<vmem>>
    %3 = tpu.memref_slice %arg11[%c0_i32_0] : memref<2x!tpu.dma_semaphore, #tpu.memory_space<semaphore_mem>> -> memref<1x!tpu.dma_semaphore, #tpu.memory_space<semaphore_mem>>
    %4 = tpu.memref_squeeze %3 : memref<1x!tpu.dma_semaphore, #tpu.memory_space<semaphore_mem>> -> memref<!tpu.dma_semaphore, #tpu.memory_space<semaphore_mem>>
    tpu.enqueue_dma source(%1 : memref<16x128xf32, #tpu.memory_space<any>>) target(%2 : memref<16x128xf32, #tpu.memory_space<vmem>>) target_semaphore(%4 : memref<!tpu.dma_semaphore, #tpu.memory_space<semaphore_mem>>)
    %c1_i32 = arith.constant 1 : i32
    %c1_i32_4 = arith.constant 1 : i32
    %c0_i32_5 = arith.constant 0 : i32
    %c0_i32_6 = arith.constant 0 : i32
    %5 = tpu.memref_slice %arg1[%c1_i32, %c0_i32_5, %c0_i32_6] : memref<2x16x128xf32, #tpu.memory_space<any>> -> memref<1x16x128xf32, #tpu.memory_space<any>>
    %6 = tpu.memref_squeeze %5 : memref<1x16x128xf32, #tpu.memory_space<any>> -> memref<16x128xf32, #tpu.memory_space<any>>
    %c40_i32 = arith.constant 40 : i32
    %c0_i32_7 = arith.constant 0 : i32
    %7 = tpu.memref_slice %arg9[%c40_i32, %c0_i32_7] : memref<56x128xf32, #tpu.memory_space<vmem>> -> memref<16x128xf32, #tpu.memory_space<vmem>>
    %8 = tpu.memref_slice %arg11[%c1_i32_4] : memref<2x!tpu.dma_semaphore, #tpu.memory_space<semaphore_mem>> -> memref<1x!tpu.dma_semaphore, #tpu.memory_space<semaphore_mem>>
    %9 = tpu.memref_squeeze %8 : memref<1x!tpu.dma_semaphore, #tpu.memory_space<semaphore_mem>> -> memref<!tpu.dma_semaphore, #tpu.memory_space<semaphore_mem>>
    tpu.enqueue_dma source(%6 : memref<16x128xf32, #tpu.memory_space<any>>) target(%7 : memref<16x128xf32, #tpu.memory_space<vmem>>) target_semaphore(%9 : memref<!tpu.dma_semaphore, #tpu.memory_space<semaphore_mem>>)
    %cst = arith.constant 0.000000e+00 : f32
    %10 = vector.broadcast %cst : f32 to vector<8x128xf32>
    %c0 = arith.constant 0 : index
    %c0_8 = arith.constant 0 : index
    %11 = vector.load %arg9[%c0, %c0_8] : memref<56x128xf32, #tpu.memory_space<vmem>>, vector<8x128xf32>
    tpu.vector_store %arg9[%c0, %c0_8], %10 {strides = array<i32>} : memref<56x128xf32, #tpu.memory_space<vmem>>, vector<8x128xf32>,
    %cst_9 = arith.constant 0.000000e+00 : f32
    %12 = vector.broadcast %cst_9 : f32 to vector<8x128xf32>
    %c8 = arith.constant 8 : index
    %c0_10 = arith.constant 0 : index
    %13 = vector.load %arg9[%c8, %c0_10] : memref<56x128xf32, #tpu.memory_space<vmem>>, vector<8x128xf32>
    tpu.vector_store %arg9[%c8, %c0_10], %12 {strides = array<i32>} : memref<56x128xf32, #tpu.memory_space<vmem>>, vector<8x128xf32>,
    %cst_11 = arith.constant 0.000000e+00 : f32
    %14 = vector.broadcast %cst_11 : f32 to vector<8x128xf32>
    %c32 = arith.constant 32 : index
    %c0_12 = arith.constant 0 : index
    %15 = vector.load %arg9[%c32, %c0_12] : memref<56x128xf32, #tpu.memory_space<vmem>>, vector<8x128xf32>
    tpu.vector_store %arg9[%c32, %c0_12], %14 {strides = array<i32>} : memref<56x128xf32, #tpu.memory_space<vmem>>, vector<8x128xf32>,
    %c0_i32_13 = arith.constant 0 : i32
    %c0_i32_14 = arith.constant 0 : i32
    %c0_i32_15 = arith.constant 0 : i32
    %c0_i32_16 = arith.constant 0 : i32
    %16 = tpu.memref_slice %arg1[%c0_i32_13, %c0_i32_15, %c0_i32_16] : memref<2x16x128xf32, #tpu.memory_space<any>> -> memref<1x16x128xf32, #tpu.memory_space<any>>
    %17 = tpu.memref_squeeze %16 : memref<1x16x128xf32, #tpu.memory_space<any>> -> memref<16x128xf32, #tpu.memory_space<any>>
    %c16_i32_17 = arith.constant 16 : i32
    %c0_i32_18 = arith.constant 0 : i32
    %18 = tpu.memref_slice %arg9[%c16_i32_17, %c0_i32_18] : memref<56x128xf32, #tpu.memory_space<vmem>> -> memref<16x128xf32, #tpu.memory_space<vmem>>
    %19 = tpu.memref_slice %arg11[%c0_i32_14] : memref<2x!tpu.dma_semaphore, #tpu.memory_space<semaphore_mem>> -> memref<1x!tpu.dma_semaphore, #tpu.memory_space<semaphore_mem>>
    %20 = tpu.memref_squeeze %19 : memref<1x!tpu.dma_semaphore, #tpu.memory_space<semaphore_mem>> -> memref<!tpu.dma_semaphore, #tpu.memory_space<semaphore_mem>>
    tpu.wait_dma2 semaphore(%20 : memref<!tpu.dma_semaphore, #tpu.memory_space<semaphore_mem>>) src(%17 : memref<16x128xf32, #tpu.memory_space<any>>) dst(%18 : memref<16x128xf32, #tpu.memory_space<vmem>>)
    %c1_i32_19 = arith.constant 1 : i32
    %c1_i32_20 = arith.constant 1 : i32
    %c0_i32_21 = arith.constant 0 : i32
    %c0_i32_22 = arith.constant 0 : i32
    %21 = tpu.memref_slice %arg1[%c1_i32_19, %c0_i32_21, %c0_i32_22] : memref<2x16x128xf32, #tpu.memory_space<any>> -> memref<1x16x128xf32, #tpu.memory_space<any>>
    %22 = tpu.memref_squeeze %21 : memref<1x16x128xf32, #tpu.memory_space<any>> -> memref<16x128xf32, #tpu.memory_space<any>>
    %c40_i32_23 = arith.constant 40 : i32
    %c0_i32_24 = arith.constant 0 : i32
    %23 = tpu.memref_slice %arg9[%c40_i32_23, %c0_i32_24] : memref<56x128xf32, #tpu.memory_space<vmem>> -> memref<16x128xf32, #tpu.memory_space<vmem>>
    %24 = tpu.memref_slice %arg11[%c1_i32_20] : memref<2x!tpu.dma_semaphore, #tpu.memory_space<semaphore_mem>> -> memref<1x!tpu.dma_semaphore, #tpu.memory_space<semaphore_mem>>
    %25 = tpu.memref_squeeze %24 : memref<1x!tpu.dma_semaphore, #tpu.memory_space<semaphore_mem>> -> memref<!tpu.dma_semaphore, #tpu.memory_space<semaphore_mem>>
    tpu.wait_dma2 semaphore(%25 : memref<!tpu.dma_semaphore, #tpu.memory_space<semaphore_mem>>) src(%22 : memref<16x128xf32, #tpu.memory_space<any>>) dst(%23 : memref<16x128xf32, #tpu.memory_space<vmem>>)
    %c6 = arith.constant 6 : index
    %c0_25 = arith.constant 0 : index
    %26 = vector.load %arg9[%c6, %c0_25] : memref<56x128xf32, #tpu.memory_space<vmem>>, vector<48x128xf32>
    %c0_26 = arith.constant 0 : index
    %c0_27 = arith.constant 0 : index
    %c0_28 = arith.constant 0 : index
    %27 = vector.load %arg2[%c0_26, %c0_27, %c0_28] : memref<2x128x128xf32, #tpu.memory_space<vmem>>, vector<1x128x128xf32>
    %28 = vector.shape_cast %27 : vector<1x128x128xf32> to vector<128x128xf32>
    %cst_29 = arith.constant dense<0.000000e+00> : vector<48x128xf32>
    %29 = tpu.matmul %26, %28, %cst_29 {dimension_numbers = #tpu.dot_dimension_numbers<[1], [0], [0], [1], [0, 0, 1, 1], [], []>} : vector<48x128xf32>, vector<128x128xf32>, vector<48x128xf32> -> vector<48x128xf32>
    %c8_30 = arith.constant 8 : index
    %c0_31 = arith.constant 0 : index
    %30 = vector.load %arg9[%c8_30, %c0_31] : memref<56x128xf32, #tpu.memory_space<vmem>>, vector<48x128xf32>
    %c1 = arith.constant 1 : index
    %c0_32 = arith.constant 0 : index
    %c0_33 = arith.constant 0 : index
    %31 = vector.load %arg2[%c1, %c0_32, %c0_33] : memref<2x128x128xf32, #tpu.memory_space<vmem>>, vector<1x128x128xf32>
    %32 = vector.shape_cast %31 : vector<1x128x128xf32> to vector<128x128xf32>
    %cst_34 = arith.constant dense<0.000000e+00> : vector<48x128xf32>
    %33 = tpu.matmul %30, %32, %cst_34 {dimension_numbers = #tpu.dot_dimension_numbers<[1], [0], [0], [1], [0, 0, 1, 1], [], []>} : vector<48x128xf32>, vector<128x128xf32>, vector<48x128xf32> -> vector<48x128xf32>
    %34 = arith.addf %29, %33 : vector<48x128xf32>
    %c0_35 = arith.constant 0 : index
    %c0_36 = arith.constant 0 : index
    %35 = vector.load %arg3[%c0_35, %c0_36] : memref<1x128xf32, #tpu.memory_space<vmem>>, vector<1x128xf32>
    %36 = vector.broadcast %35 : vector<1x128xf32> to vector<48x128xf32>
    %37 = arith.addf %34, %36 : vector<48x128xf32>
    %cst_37 = arith.constant 0.000000e+00 : f32
    %38 = vector.broadcast %cst_37 : f32 to vector<48x128xf32>
    %39 = arith.maximumf %37, %38 : vector<48x128xf32>
    %c8_38 = arith.constant 8 : index
    %c0_39 = arith.constant 0 : index
    %40 = vector.load %arg10[%c8_38, %c0_39] : memref<56x128xf32, #tpu.memory_space<vmem>>, vector<48x128xf32>
    tpu.vector_store %arg10[%c8_38, %c0_39], %39 {strides = array<i32>} : memref<56x128xf32, #tpu.memory_space<vmem>>, vector<48x128xf32>,
    %cst_40 = arith.constant 0.000000e+00 : f32
    %41 = vector.broadcast %cst_40 : f32 to vector<8x128xf32>
    %c8_41 = arith.constant 8 : index
    %c0_42 = arith.constant 0 : index
    %42 = vector.load %arg10[%c8_41, %c0_42] : memref<56x128xf32, #tpu.memory_space<vmem>>, vector<8x128xf32>
    tpu.vector_store %arg10[%c8_41, %c0_42], %41 {strides = array<i32>} : memref<56x128xf32, #tpu.memory_space<vmem>>, vector<8x128xf32>,
    %cst_43 = arith.constant 0.000000e+00 : f32
    %43 = vector.broadcast %cst_43 : f32 to vector<8x128xf32>
    %c32_44 = arith.constant 32 : index
    %c0_45 = arith.constant 0 : index
    %44 = vector.load %arg10[%c32_44, %c0_45] : memref<56x128xf32, #tpu.memory_space<vmem>>, vector<8x128xf32>
    tpu.vector_store %arg10[%c32_44, %c0_45], %43 {strides = array<i32>} : memref<56x128xf32, #tpu.memory_space<vmem>>, vector<8x128xf32>,
    %c14 = arith.constant 14 : index
    %c0_46 = arith.constant 0 : index
    %45 = vector.load %arg10[%c14, %c0_46] : memref<56x128xf32, #tpu.memory_space<vmem>>, vector<16x128xf32>
    %c0_47 = arith.constant 0 : index
    %c0_48 = arith.constant 0 : index
    %c0_49 = arith.constant 0 : index
    %46 = vector.load %arg4[%c0_47, %c0_48, %c0_49] : memref<2x128x128xf32, #tpu.memory_space<vmem>>, vector<1x128x128xf32>
    %47 = vector.shape_cast %46 : vector<1x128x128xf32> to vector<128x128xf32>
    %cst_50 = arith.constant dense<0.000000e+00> : vector<16x128xf32>
    %48 = tpu.matmul %45, %47, %cst_50 {dimension_numbers = #tpu.dot_dimension_numbers<[1], [0], [0], [1], [0, 0, 1, 1], [], []>} : vector<16x128xf32>, vector<128x128xf32>, vector<16x128xf32> -> vector<16x128xf32>
    %c16 = arith.constant 16 : index
    %c0_51 = arith.constant 0 : index
    %49 = vector.load %arg10[%c16, %c0_51] : memref<56x128xf32, #tpu.memory_space<vmem>>, vector<16x128xf32>
    %c1_52 = arith.constant 1 : index
    %c0_53 = arith.constant 0 : index
    %c0_54 = arith.constant 0 : index
    %50 = vector.load %arg4[%c1_52, %c0_53, %c0_54] : memref<2x128x128xf32, #tpu.memory_space<vmem>>, vector<1x128x128xf32>
    %51 = vector.shape_cast %50 : vector<1x128x128xf32> to vector<128x128xf32>
    %cst_55 = arith.constant dense<0.000000e+00> : vector<16x128xf32>
    %52 = tpu.matmul %49, %51, %cst_55 {dimension_numbers = #tpu.dot_dimension_numbers<[1], [0], [0], [1], [0, 0, 1, 1], [], []>} : vector<16x128xf32>, vector<128x128xf32>, vector<16x128xf32> -> vector<16x128xf32>
    %53 = arith.addf %48, %52 : vector<16x128xf32>
    %c0_56 = arith.constant 0 : index
    %c0_57 = arith.constant 0 : index
    %54 = vector.load %arg5[%c0_56, %c0_57] : memref<1x128xf32, #tpu.memory_space<vmem>>, vector<1x128xf32>
    %55 = vector.broadcast %54 : vector<1x128xf32> to vector<16x128xf32>
    %56 = arith.addf %53, %55 : vector<16x128xf32>
    %cst_58 = arith.constant 0.000000e+00 : f32
    %57 = vector.broadcast %cst_58 : f32 to vector<16x128xf32>
    %58 = arith.maximumf %56, %57 : vector<16x128xf32>
    %c16_59 = arith.constant 16 : index
    %c0_60 = arith.constant 0 : index
    %59 = vector.load %arg9[%c16_59, %c0_60] : memref<56x128xf32, #tpu.memory_space<vmem>>, vector<16x128xf32>
    %60 = arith.addf %58, %59 : vector<16x128xf32>
    %cst_61 = arith.constant 0.000000e+00 : f32
    %61 = vector.broadcast %cst_61 : f32 to vector<16x128xf32>
    %62 = arith.maximumf %60, %61 : vector<16x128xf32>
    %c0_62 = arith.constant 0 : index
    %c0_63 = arith.constant 0 : index
    %63 = vector.load %arg6[%c0_62, %c0_63] : memref<128x128xf32, #tpu.memory_space<vmem>>, vector<128x128xf32>
    %cst_64 = arith.constant dense<0.000000e+00> : vector<16x128xf32>
    %64 = tpu.matmul %62, %63, %cst_64 {dimension_numbers = #tpu.dot_dimension_numbers<[1], [0], [0], [1], [0, 0, 1, 1], [], []>} : vector<16x128xf32>, vector<128x128xf32>, vector<16x128xf32> -> vector<16x128xf32>
    %c0_65 = arith.constant 0 : index
    %c0_66 = arith.constant 0 : index
    %65 = vector.load %arg7[%c0_65, %c0_66] : memref<1x128xf32, #tpu.memory_space<vmem>>, vector<1x128xf32>
    %66 = vector.broadcast %65 : vector<1x128xf32> to vector<16x128xf32>
    %67 = arith.addf %64, %66 : vector<16x128xf32>
    %c0_67 = arith.constant 0 : index
    %c0_68 = arith.constant 0 : index
    %c0_69 = arith.constant 0 : index
    %68 = vector.load %arg8[%c0_67, %c0_68, %c0_69] : memref<2x16x128xf32, #tpu.memory_space<vmem>>, vector<1x16x128xf32>
    %69 = vector.shape_cast %68 : vector<1x16x128xf32> to vector<16x128xf32>
    %70 = vector.shape_cast %67 : vector<16x128xf32> to vector<1x16x128xf32>
    tpu.vector_store %arg8[%c0_67, %c0_68, %c0_69], %70 {strides = array<i32>} : memref<2x16x128xf32, #tpu.memory_space<vmem>>, vector<1x16x128xf32>,
    %c38 = arith.constant 38 : index
    %c0_70 = arith.constant 0 : index
    %71 = vector.load %arg10[%c38, %c0_70] : memref<56x128xf32, #tpu.memory_space<vmem>>, vector<16x128xf32>
    %c0_71 = arith.constant 0 : index
    %c0_72 = arith.constant 0 : index
    %c0_73 = arith.constant 0 : index
    %72 = vector.load %arg4[%c0_71, %c0_72, %c0_73] : memref<2x128x128xf32, #tpu.memory_space<vmem>>, vector<1x128x128xf32>
    %73 = vector.shape_cast %72 : vector<1x128x128xf32> to vector<128x128xf32>
    %cst_74 = arith.constant dense<0.000000e+00> : vector<16x128xf32>
    %74 = tpu.matmul %71, %73, %cst_74 {dimension_numbers = #tpu.dot_dimension_numbers<[1], [0], [0], [1], [0, 0, 1, 1], [], []>} : vector<16x128xf32>, vector<128x128xf32>, vector<16x128xf32> -> vector<16x128xf32>
    %c40 = arith.constant 40 : index
    %c0_75 = arith.constant 0 : index
    %75 = vector.load %arg10[%c40, %c0_75] : memref<56x128xf32, #tpu.memory_space<vmem>>, vector<16x128xf32>
    %c1_76 = arith.constant 1 : index
    %c0_77 = arith.constant 0 : index
    %c0_78 = arith.constant 0 : index
    %76 = vector.load %arg4[%c1_76, %c0_77, %c0_78] : memref<2x128x128xf32, #tpu.memory_space<vmem>>, vector<1x128x128xf32>
    %77 = vector.shape_cast %76 : vector<1x128x128xf32> to vector<128x128xf32>
    %cst_79 = arith.constant dense<0.000000e+00> : vector<16x128xf32>
    %78 = tpu.matmul %75, %77, %cst_79 {dimension_numbers = #tpu.dot_dimension_numbers<[1], [0], [0], [1], [0, 0, 1, 1], [], []>} : vector<16x128xf32>, vector<128x128xf32>, vector<16x128xf32> -> vector<16x128xf32>
    %79 = arith.addf %74, %78 : vector<16x128xf32>
    %c0_80 = arith.constant 0 : index
    %c0_81 = arith.constant 0 : index
    %80 = vector.load %arg5[%c0_80, %c0_81] : memref<1x128xf32, #tpu.memory_space<vmem>>, vector<1x128xf32>
    %81 = vector.broadcast %80 : vector<1x128xf32> to vector<16x128xf32>
    %82 = arith.addf %79, %81 : vector<16x128xf32>
    %cst_82 = arith.constant 0.000000e+00 : f32
    %83 = vector.broadcast %cst_82 : f32 to vector<16x128xf32>
    %84 = arith.maximumf %82, %83 : vector<16x128xf32>
    %c40_83 = arith.constant 40 : index
    %c0_84 = arith.constant 0 : index
    %85 = vector.load %arg9[%c40_83, %c0_84] : memref<56x128xf32, #tpu.memory_space<vmem>>, vector<16x128xf32>
    %86 = arith.addf %84, %85 : vector<16x128xf32>
    %cst_85 = arith.constant 0.000000e+00 : f32
    %87 = vector.broadcast %cst_85 : f32 to vector<16x128xf32>
    %88 = arith.maximumf %86, %87 : vector<16x128xf32>
    %c0_86 = arith.constant 0 : index
    %c0_87 = arith.constant 0 : index
    %89 = vector.load %arg6[%c0_86, %c0_87] : memref<128x128xf32, #tpu.memory_space<vmem>>, vector<128x128xf32>
    %cst_88 = arith.constant dense<0.000000e+00> : vector<16x128xf32>
    %90 = tpu.matmul %88, %89, %cst_88 {dimension_numbers = #tpu.dot_dimension_numbers<[1], [0], [0], [1], [0, 0, 1, 1], [], []>} : vector<16x128xf32>, vector<128x128xf32>, vector<16x128xf32> -> vector<16x128xf32>
    %c0_89 = arith.constant 0 : index
    %c0_90 = arith.constant 0 : index
    %91 = vector.load %arg7[%c0_89, %c0_90] : memref<1x128xf32, #tpu.memory_space<vmem>>, vector<1x128xf32>
    %92 = vector.broadcast %91 : vector<1x128xf32> to vector<16x128xf32>
    %93 = arith.addf %90, %92 : vector<16x128xf32>
    %c1_91 = arith.constant 1 : index
    %c0_92 = arith.constant 0 : index
    %c0_93 = arith.constant 0 : index
    %94 = vector.load %arg8[%c1_91, %c0_92, %c0_93] : memref<2x16x128xf32, #tpu.memory_space<vmem>>, vector<1x16x128xf32>
    %95 = vector.shape_cast %94 : vector<1x16x128xf32> to vector<16x128xf32>
    %96 = vector.shape_cast %93 : vector<16x128xf32> to vector<1x16x128xf32>
    tpu.vector_store %arg8[%c1_91, %c0_92, %c0_93], %96 {strides = array<i32>} : memref<2x16x128xf32, #tpu.memory_space<vmem>>, vector<1x16x128xf32>,
    return
  }
  func.func @transform_1(%arg0: i32) -> (i32, i32, i32) {
    %c0_i32 = arith.constant 0 : i32
    %c0_i32_0 = arith.constant 0 : i32
    %c0_i32_1 = arith.constant 0 : i32
    %c0_i32_2 = arith.constant 0 : i32
    return %c0_i32, %c0_i32_0, %c0_i32_1 : i32, i32, i32
  }
  func.func @transform_2(%arg0: i32) -> (i32, i32) {
    %c0_i32 = arith.constant 0 : i32
    %c0_i32_0 = arith.constant 0 : i32
    %c0_i32_1 = arith.constant 0 : i32
    return %c0_i32, %c0_i32_0 : i32, i32
  }
  func.func @transform_3(%arg0: i32) -> (i32, i32, i32) {
    %c0_i32 = arith.constant 0 : i32
    %c0_i32_0 = arith.constant 0 : i32
    %c0_i32_1 = arith.constant 0 : i32
    %c0_i32_2 = arith.constant 0 : i32
    return %c0_i32, %c0_i32_0, %c0_i32_1 : i32, i32, i32
  }
  func.func @transform_4(%arg0: i32) -> (i32, i32) {
    %c0_i32 = arith.constant 0 : i32
    %c0_i32_0 = arith.constant 0 : i32
    %c0_i32_1 = arith.constant 0 : i32
    return %c0_i32, %c0_i32_0 : i32, i32
  }
  func.func @transform_5(%arg0: i32) -> (i32, i32) {
    %c0_i32 = arith.constant 0 : i32
    %c0_i32_0 = arith.constant 0 : i32
    %c0_i32_1 = arith.constant 0 : i32
    return %c0_i32, %c0_i32_0 : i32, i32
  }
  func.func @transform_6(%arg0: i32) -> (i32, i32) {
    %c0_i32 = arith.constant 0 : i32
    %c0_i32_0 = arith.constant 0 : i32
    %c0_i32_1 = arith.constant 0 : i32
    return %c0_i32, %c0_i32_0 : i32, i32
  }
  func.func @transform_7(%arg0: i32) -> (i32, i32, i32) {
    %c0_i32 = arith.constant 0 : i32
    %c0_i32_0 = arith.constant 0 : i32
    %c0_i32_1 = arith.constant 0 : i32
    %c0_i32_2 = arith.constant 0 : i32
    return %c0_i32, %c0_i32_0, %c0_i32_1 : i32, i32, i32
  }
}

</mosaic_0001>

<bundles_post_ra>
// kernel: tcn_forward.3
= control target key start
LH: loop header
LB: loop body
LE: loop exit
PB: predicated region body
PF: predicated region fallthrough
CT: control target
= control target key end

     0   :  { %12 = vsyncpa [#allocation6], 0  ;;  %s2272_s0 = inlined_call_operand.vmem [shape: f32[2,16,128], index: 0, kind: input, shape index: {}]   ;;  %s2273_s1 = inlined_call_operand.vmem [shape: f32[2,128,128], index: 1, kind: input, shape index: {}]   ;;  %s2274_s2 = inlined_call_operand.vmem [shape: f32[1,128], index: 2, kind: input, shape index: {}]   ;;  %s2275_s3 = inlined_call_operand.vmem [shape: f32[2,128,128], index: 3, kind: input, shape index: {}]   ;;  %s2276_s4 = inlined_call_operand.vmem [shape: f32[1,128], index: 4, kind: input, shape index: {}]   ;;  %s2277_s5 = inlined_call_operand.vmem [shape: f32[128,128], index: 5, kind: input, shape index: {}]   ;;  %s2278_s6 = inlined_call_operand.vmem [shape: f32[1,128], index: 6, kind: input, shape index: {}]   ;;  %s2279_s7 = inlined_call_operand.hbm [shape: f32[2,16,128], index: 7, kind: output, shape index: {}]  }
   0x1   :  { %v58_v0 = vld [vmem:[%s2272_s0] sm:$0xff]  ;;  %v60_v1 = vld [vmem:[%s2272_s0 + $0x8] sm:$0xff] }
   0x2   :  { %59 = vst [vmem:[#allocation2 + $0x10] sm:$0xff] %v58_v0  ;;  %61 = vst [vmem:[#allocation2 + $0x18] sm:$0xff] %v60_v1 }
   0x3   :  { %69 = vsyncadd [#allocation4], 256  ;;  %v1040_v2 = vld [vmem:[%s2272_s0 + $0x10] sm:$0xff]  ;;  %v1041_v3 = vld [vmem:[%s2272_s0 + $0x18] sm:$0xff] }
   0x4   :  { %106 = vst [vmem:[#allocation2 + $0x28] sm:$0xff] %v1040_v2  ;;  %108 = vst [vmem:[#allocation2 + $0x30] sm:$0xff] %v1041_v3 }
   0x5   :  { %116 = vsyncadd [#allocation4 + $0x1], 256  ;;  %v1840_v4 = vmov 0.0  }
   0x6   :  { %117 = vst [vmem:[#allocation2] sm:$0xff] %v1840_v4  ;;  %118 = vst [vmem:[#allocation2 + $0x8] sm:$0xff] %v1840_v4 }
   0x7   :  { %119 = vst [vmem:[#allocation2 + $0x20] sm:$0xff] %v1840_v4 }
   0x8   :  { %1834 = dma.done.wait [#allocation4], 256 }
   0x9   :  { %1835 = vsyncadd [#allocation4], 4294967040 }
   0xa   :  { %1836 = dma.done.wait [#allocation4 + $0x1], 256 }
   0xb   :  { %1837 = vsyncadd [#allocation4 + $0x1], 4294967040  ;;  %385 = vst [vmem:[#allocation3 + $0x8] sm:$0xff] %v1840_v4  ;;  %v1043_v5 = vld [vmem:[%s2273_s1 + $0x80] sm:$0xff]  ;;  %v1044_v6 = vld [vmem:[%s2273_s1 + $0x88] sm:$0xff]  ;;  %s1841_s21 = smov [#allocation5]  }
   0xc   :  { %386 = vst [vmem:[#allocation3 + $0x20] sm:$0xff] %v1840_v4  ;;  %v1045_v7 = vld [vmem:[%s2273_s1 + $0x90] sm:$0xff]  ;;  %v1542_v8 = vpack.c.bf16 %v1044_v6, %v1043_v5  ;;  %v1046_v9 = vld [vmem:[%s2273_s1 + $0x98] sm:$0xff]  ;;  %v1047_v11 = vld [vmem:[%s2273_s1 + $0xa0] sm:$0xff]  ;;  %s1000_s22 = sshll.u32 %s1841_s21, 4  ;;  %s1001_s22 = int_to_ptr.vmem [resolvable:$true] %s1000_s22 }
   0xd   :  { %v1546_v10 = vpack.c.bf16 %v1046_v9, %v1045_v7  ;;  %v1048_v12 = vld [vmem:[%s2273_s1 + $0xa8] sm:$0xff]  ;;  %v1049_v15 = vld [vmem:[%s2273_s1 + $0xb0] sm:$0xff]  ;;  %v1050_v16 = vld [vmem:[%s2273_s1 + $0xb8] sm:$0xff]  ;;  %s1812_s23 = scalar_lea.vmem %s1001_s22, 512  ;;  %p1817_p1 = scmp.lt.s32.totalorder %s1001_s22, %s1001_s22 }
   0xe   :  { %1543 = vmatprep.subr.bf16.mxu0 %v1542_v8  ;;  %v1550_v13 = vpack.c.bf16 %v1048_v12, %v1047_v11  ;;  %v147_v14 = vld [vmem:[#allocation2 + $0x8] sm:$0xff]  ;;  %v1554_v17 = vpack.c.bf16 %v1050_v16, %v1049_v15  ;;  %v1051_v18 = vld [vmem:[%s2273_s1 + $0xc0] sm:$0xff]  ;;  %v1053_v21 = vld [vmem:[%s2273_s1 + $0xd0] sm:$0xff]  ;;  %p1813_p0 = scmp.ne.s32.totalorder %s1001_s22, %s1812_s23  ;;  %p1818_p2 = scmp.lt.s32.totalorder %s1812_s23, %s1812_s23 }
   0xf   :  { %1545 = vmatpush3.bf16.msra.mxu0 %v1542_v8  ;;  %1282 = vmatprep.mubr.f32.mxu0 %v147_v14  ;;  %v1052_v19 = vld [vmem:[%s2273_s1 + $0xc8] sm:$0xff]  ;;  %v1054_v22 = vld [vmem:[%s2273_s1 + $0xd8] sm:$0xff]  ;;  %v1060_v23 = vld [vmem:[%s2275_s3 + $0x80] sm:$0xff] }
  0x10   :  { %1547 = vmatprep.subr.bf16.mxu0 %v1546_v10  ;;  %v1558_v20 = vpack.c.bf16 %v1052_v19, %v1051_v18  ;;  %v1061_v24 = vld [vmem:[%s2275_s3 + $0x88] sm:$0xff]  ;;  %v1062_v25 = vld [vmem:[%s2275_s3 + $0x90] sm:$0xff]  ;;  %v1063_v26 = vld [vmem:[%s2275_s3 + $0x98] sm:$0xff]  ;;  %v1562_v29 = vpack.c.bf16 %v1054_v22, %v1053_v21  ;;  %p1819_p3 = por %p1818_p2, %p1817_p1 }
  0x11   :  { %v1944_v27 = vpack.c.bf16 %v1061_v24, %v1060_v23  ;;  %v1946_v28 = vpack.c.bf16 %v1063_v26, %v1062_v25  ;;  %v1064_v30 = vld [vmem:[%s2275_s3 + $0xa0] sm:$0xff]  ;;  %v1065_v31 = vld [vmem:[%s2275_s3 + $0xa8] sm:$0xff]  ;;  %v1066_v36 = vld [vmem:[%s2275_s3 + $0xb0] sm:$0xff] }
  0x12   :  { %v1055_v32 = vld [vmem:[%s2273_s1 + $0xe0] sm:$0xff]  ;;  %v1056_v33 = vld [vmem:[%s2273_s1 + $0xe8] sm:$0xff]  ;;  %v1963_v34 = vpack.c.bf16 %v1065_v31, %v1064_v30  ;;  %v1067_v37 = vld [vmem:[%s2275_s3 + $0xb8] sm:$0xff]  ;;  %p1820_p4 = pnand %p1819_p3, %p1813_p0 }
  0x13   :  { %1549 = vmatpush3.bf16.msra.mxu0 %v1546_v10  ;;  %1607 = vmatprep.subr.bf16.mxu1 %v1944_v27  ;;  %v1566_v35 = vpack.c.bf16 %v1056_v33, %v1055_v32  ;;  %v1057_v38 = vld [vmem:[%s2273_s1 + $0xf0] sm:$0xff]  ;;  %v1058_v39 = vld [vmem:[%s2273_s1 + $0xf8] sm:$0xff]  ;;  %v1979_v40 = vpack.c.bf16 %v1067_v37, %v1066_v36  ;;  %v131_v42 = vld [vmem:[%s2273_s1] sm:$0xff] }
  0x14   :  { %1551 = vmatprep.subr.bf16.mxu0 %v1550_v13  ;;  %1609 = vmatpush3.bf16.msra.mxu1 %v1944_v27  ;;  %v1570_v41 = vpack.c.bf16 %v1058_v39, %v1057_v38  ;;  %v132_v43 = vld [vmem:[%s2273_s1 + $0x8] sm:$0xff]  ;;  %v133_v45 = vld [vmem:[%s2273_s1 + $0x10] sm:$0xff]  ;;  %v134_v46 = vld [vmem:[%s2273_s1 + $0x18] sm:$0xff] }
  0x15   :  { %1611 = vmatprep.subr.bf16.mxu1 %v1946_v28  ;;  %v1574_v44 = vpack.c.bf16 %v132_v43, %v131_v42  ;;  %v1996_v47 = vld [vmem:[#allocation2 + $0x10] sm:$0xff]  ;;  %v1578_v48 = vpack.c.bf16 %v134_v46, %v133_v45  ;;  %v1998_v49 = vld [vmem:[#allocation2 + $0x18] sm:$0xff]  ;;  %v135_v50 = vld [vmem:[%s2273_s1 + $0x20] sm:$0xff] }
  0x16   :  { %v136_v51 = vld [vmem:[%s2273_s1 + $0x28] sm:$0xff]  ;;  %v150_v52 = vld [vmem:[#allocation2 + $0x20] sm:$0xff]  ;;  %v137_v55 = vld [vmem:[%s2273_s1 + $0x30] sm:$0xff] }
  0x17   :  { %1553 = vmatpush3.bf16.msra.mxu0 %v1550_v13  ;;  %v1582_v53 = vpack.c.bf16 %v136_v51, %v135_v50  ;;  %v2008_v54 = vld [vmem:[#allocation2 + $0x28] sm:$0xff]  ;;  %v138_v56 = vld [vmem:[%s2273_s1 + $0x38] sm:$0xff]  ;;  %v2017_v57 = vld [vmem:[#allocation2 + $0x30] sm:$0xff] }
  0x18   :  { %1555 = vmatprep.subr.bf16.mxu0 %v1554_v17  ;;  %1613 = vmatpush3.bf16.msra.mxu1 %v1946_v28  ;;  %v1586_v58 = vpack.c.bf16 %v138_v56, %v137_v55  ;;  %v125_v59 = vld [vmem:[#allocation2 + $0x6] sm:$0xff]  ;;  %v141_v63 = vld [vmem:[%s2273_s1 + $0x50] sm:$0xff]  ;;  %v142_v0 = vld [vmem:[%s2273_s1 + $0x58] sm:$0xff] }
  0x19   :  { %1615 = vmatprep.subr.bf16.mxu1 %v1963_v34  ;;  %v139_v60 = vld [vmem:[%s2273_s1 + $0x40] sm:$0xff]  ;;  %v140_v61 = vld [vmem:[%s2273_s1 + $0x48] sm:$0xff]  ;;  %v1594_v1 = vpack.c.bf16 %v142_v0, %v141_v63  ;;  %v145_v5 = vld [vmem:[%s2273_s1 + $0x70] sm:$0xff] }
  0x1a   :  { %v1590_v62 = vpack.c.bf16 %v140_v61, %v139_v60  ;;  %v143_v2 = vld [vmem:[%s2273_s1 + $0x60] sm:$0xff]  ;;  %v144_v3 = vld [vmem:[%s2273_s1 + $0x68] sm:$0xff]  ;;  %v146_v6 = vld [vmem:[%s2273_s1 + $0x78] sm:$0xff] }
  0x1b   :  { %1557 = vmatpush3.bf16.msra.mxu0 %v1554_v17  ;;  %v1598_v4 = vpack.c.bf16 %v144_v3, %v143_v2  ;;  %v1602_v7 = vpack.c.bf16 %v146_v6, %v145_v5  ;;  %v126_v8 = vld [vmem:[#allocation2 + $0xe] sm:$0xff]  ;;  %v127_v9 = vld [vmem:[#allocation2 + $0x16] sm:$0xff]  ;;  %v128_v10 = vld [vmem:[#allocation2 + $0x1e] sm:$0xff] }
  0x1c   :  { %1559 = vmatprep.subr.bf16.mxu0 %v1558_v20  ;;  %1617 = vmatpush3.bf16.msra.mxu1 %v1963_v34  ;;  %v129_v11 = vld [vmem:[#allocation2 + $0x26] sm:$0xff]  ;;  %v130_v12 = vld [vmem:[#allocation2 + $0x2e] sm:$0xff]  ;;  %v1071_v17 = vld [vmem:[%s2275_s3 + $0xd8] sm:$0xff] }
  0x1d   :  { %1619 = vmatprep.subr.bf16.mxu1 %v1979_v40  ;;  %v1068_v13 = vld [vmem:[%s2275_s3 + $0xc0] sm:$0xff]  ;;  %v1069_v14 = vld [vmem:[%s2275_s3 + $0xc8] sm:$0xff]  ;;  %v1070_v16 = vld [vmem:[%s2275_s3 + $0xd0] sm:$0xff] }
  0x1e   :  { %v2050_v15 = vpack.c.bf16 %v1069_v14, %v1068_v13  ;;  %v2060_v18 = vpack.c.bf16 %v1071_v17, %v1070_v16  ;;  %v1072_v19 = vld [vmem:[%s2275_s3 + $0xe0] sm:$0xff]  ;;  %v1074_v22 = vld [vmem:[%s2275_s3 + $0xf0] sm:$0xff]  ;;  %v1075_v23 = vld [vmem:[%s2275_s3 + $0xf8] sm:$0xff] }
  0x1f   :  { %1561 = vmatpush3.bf16.msra.mxu0 %v1558_v20  ;;  %v1073_v20 = vld [vmem:[%s2275_s3 + $0xe8] sm:$0xff]  ;;  %v2080_v24 = vpack.c.bf16 %v1075_v23, %v1074_v22  ;;  %v389_v25 = vld [vmem:[%s2275_s3] sm:$0xff]  ;;  %v593_v32 = vld [vmem:[%s2277_s5 + $0x10] sm:$0xff] }
  0x20   :  { %1563 = vmatprep.subr.bf16.mxu0 %v1562_v29  ;;  %1621 = vmatpush3.bf16.msra.mxu1 %v1979_v40  ;;  %v2070_v21 = vpack.c.bf16 %v1073_v20, %v1072_v19  ;;  %v390_v26 = vld [vmem:[%s2275_s3 + $0x8] sm:$0xff]  ;;  %v591_v30 = vld [vmem:[%s2277_s5] sm:$0xff]  ;;  %v598_v42 = vld [vmem:[%s2277_s5 + $0x38] sm:$0xff] }
  0x21   :  { %1623 = vmatprep.subr.bf16.mxu1 %v2050_v15  ;;  %v592_v31 = vld [vmem:[%s2277_s5 + $0x8] sm:$0xff]  ;;  %v595_v37 = vld [vmem:[%s2277_s5 + $0x20] sm:$0xff]  ;;  %v602_v50 = vld [vmem:[%s2277_s5 + $0x58] sm:$0xff] }
  0x22   :  { %v2102_v33 = vpack.c.bf16 %v592_v31, %v591_v30  ;;  %v596_v38 = vld [vmem:[%s2277_s5 + $0x28] sm:$0xff]  ;;  %v391_v61 = vld [vmem:[%s2275_s3 + $0x10] sm:$0xff]  ;;  %v393_v5 = vld [vmem:[%s2275_s3 + $0x20] sm:$0xff] }
  0x23   :  { %1565 = vmatpush3.bf16.msra.mxu0 %v1562_v29  ;;  %v2090_v29 = vpack.c.bf16 %v390_v26, %v389_v25  ;;  %v2118_v39 = vpack.c.bf16 %v596_v38, %v595_v37  ;;  %v600_v45 = vld [vmem:[%s2277_s5 + $0x48] sm:$0xff]  ;;  %v396_v13 = vld [vmem:[%s2275_s3 + $0x38] sm:$0xff]  ;;  %v397_v16 = vld [vmem:[%s2275_s3 + $0x40] sm:$0xff] }
  0x24   :  { %1567 = vmatprep.subr.bf16.mxu0 %v1566_v35  ;;  %1625 = vmatpush3.bf16.msra.mxu1 %v2050_v15  ;;  %v394_v6 = vld [vmem:[%s2275_s3 + $0x28] sm:$0xff]  ;;  %v399_v20 = vld [vmem:[%s2275_s3 + $0x50] sm:$0xff]  ;;  %v400_v22 = vld [vmem:[%s2275_s3 + $0x58] sm:$0xff] }
  0x25   :  { %1627 = vmatprep.subr.bf16.mxu1 %v2060_v18  ;;  %v398_v17 = vld [vmem:[%s2275_s3 + $0x48] sm:$0xff]  ;;  %v1658_v23 = vpack.c.bf16 %v400_v22, %v399_v20  ;;  %v401_v25 = vld [vmem:[%s2275_s3 + $0x60] sm:$0xff]  ;;  %v403_v31 = vld [vmem:[%s2275_s3 + $0x70] sm:$0xff] }
  0x26   :  { %v1654_v19 = vpack.c.bf16 %v398_v17, %v397_v16  ;;  %v402_v26 = vld [vmem:[%s2275_s3 + $0x68] sm:$0xff] }
  0x27   :  { %1569 = vmatpush3.bf16.msra.mxu0 %v1566_v35  ;;  %v594_v35 = vld [vmem:[%s2277_s5 + $0x18] sm:$0xff]  ;;  %v1662_v30 = vpack.c.bf16 %v402_v26, %v401_v25 }
  0x28   :  { %1571 = vmatprep.subr.bf16.mxu0 %v1570_v41  ;;  %1629 = vmatpush3.bf16.msra.mxu1 %v2060_v18  ;;  %v2107_v36 = vpack.c.bf16 %v594_v35, %v593_v32  ;;  %v404_v32 = vld [vmem:[%s2275_s3 + $0x78] sm:$0xff] }
  0x29   :  { %1631 = vmatprep.subr.bf16.mxu1 %v2070_v21  ;;  %v1666_v35 = vpack.c.bf16 %v404_v32, %v403_v31 }
  0x2b   :  { %1573 = vmatpush3.bf16.msra.mxu0 %v1570_v41  ;;  %v597_v41 = vld [vmem:[%s2277_s5 + $0x30] sm:$0xff] }
  0x2c   :  { %1575 = vmatprep.subr.bf16.mxu0 %v1574_v44  ;;  %1633 = vmatpush3.bf16.msra.mxu1 %v2070_v21  ;;  %v2128_v43 = vpack.c.bf16 %v598_v42, %v597_v41 }
  0x2d   :  { %1635 = vmatprep.subr.bf16.mxu1 %v2080_v24 }
  0x2e   :  { %1283 = vmatmul.mubr.f32.vlgmr.msra.gmra.mrb[0].mxu0 %v1996_v47 }
  0x2f   :  { %1577 = vmatpush3.bf16.msra.mxu0 %v1574_v44  ;;  %1285 = vmatprep.mubr.f32.mxu0 %v1998_v49  ;;  %v599_v44 = vld [vmem:[%s2277_s5 + $0x40] sm:$0xff] }
  0x30   :  { %1579 = vmatprep.subr.bf16.mxu0 %v1578_v48  ;;  %1637 = vmatpush3.bf16.msra.mxu1 %v2080_v24  ;;  %v2138_v46 = vpack.c.bf16 %v600_v45, %v599_v44 }
  0x31   :  { %1639 = vmatprep.subr.bf16.mxu1 %v2090_v29 }
  0x32   :  { %1286 = vmatmul.mubr.f32.gmra.mrb[2].mxu0 %v150_v52  ;;  %v1059_v52 = vld [vmem:[%s2274_s2] ss:$0 sm:$0xff] }
  0x33   :  { %1581 = vmatpush3.bf16.msra.mxu0 %v1578_v48  ;;  %1288 = vmatprep.mubr.f32.mxu0 %v2008_v54  ;;  %v601_v48 = vld [vmem:[%s2277_s5 + $0x50] sm:$0xff] }
  0x34   :  { %1583 = vmatprep.subr.bf16.mxu0 %v1582_v53  ;;  %v2148_v51 = vpack.c.bf16 %v602_v50, %v601_v48 }
  0x36   :  { %1289 = vmatmul.mubr.f32.gmra.mrb[4].mxu0 %v2017_v57 }
  0x37   :  { %1585 = vmatpush3.bf16.msra.mxu0 %v1582_v53  ;;  %1323 = vmatprep.mubr.f32.mxu0 %v125_v59 }
  0x38   :  { %1587 = vmatprep.subr.bf16.mxu0 %v1586_v58 }
  0x3b   :  { %1589 = vmatpush3.bf16.msra.mxu0 %v1586_v58 }
  0x3c   :  { %1591 = vmatprep.subr.bf16.mxu0 %v1590_v62 }
  0x3f   :  { %1593 = vmatpush3.bf16.msra.mxu0 %v1590_v62  ;;  %v392_v62 = vld [vmem:[%s2275_s3 + $0x18] sm:$0xff] }
  0x40   :  { %1595 = vmatprep.subr.bf16.mxu0 %v1594_v1  ;;  %v2162_v2 = vpack.c.bf16 %v392_v62, %v391_v61 }
  0x43   :  { %1597 = vmatpush3.bf16.msra.mxu0 %v1594_v1 }
  0x44   :  { %1599 = vmatprep.subr.bf16.mxu0 %v1598_v4 }
  0x47   :  { %1601 = vmatpush3.bf16.msra.mxu0 %v1598_v4 }
  0x48   :  { %1603 = vmatprep.subr.bf16.mxu0 %v1602_v7 }
  0x4b   :  { %1605 = vmatpush3.bf16.msra.mxu0 %v1602_v7 }
  0x4c   :  { %1671 = vmatprep.subr.bf16.mxu0 %v2102_v33 }
  0x4e   :  { %1324 = vmatmul.mubr.f32.vlgmr.msra.gmra.mrb[0].mxu0 %v126_v8 }
  0x4f   :  { %1326 = vmatprep.mubr.f32.mxu0 %v127_v9  ;;  %1673 = vmatpush3.bf16.msra.mxu0 %v2102_v33 }
  0x50   :  { %1675 = vmatprep.subr.bf16.mxu0 %v2107_v36 }
  0x52   :  { %1327 = vmatmul.mubr.f32.gmra.mrb[2].mxu0 %v128_v10 }
  0x53   :  { %1329 = vmatprep.mubr.f32.mxu0 %v129_v11  ;;  %1677 = vmatpush3.bf16.msra.mxu0 %v2107_v36  ;;  %v1646_v11 = vpack.c.bf16 %v394_v6, %v393_v5 }
  0x54   :  { %1679 = vmatprep.subr.bf16.mxu0 %v2118_v39 }
  0x56   :  { %1330 = vmatmul.mubr.f32.gmra.mrb[4].mxu0 %v130_v12  ;;  %v395_v12 = vld [vmem:[%s2275_s3 + $0x30] sm:$0xff] }
  0x57   :  { %1681 = vmatpush3.bf16.msra.mxu0 %v2118_v39  ;;  %v1650_v14 = vpack.c.bf16 %v396_v13, %v395_v12 }
  0x58   :  { %1683 = vmatprep.subr.bf16.mxu0 %v2128_v43 }
  0x5b   :  { %1685 = vmatpush3.bf16.msra.mxu0 %v2128_v43 }
  0x5c   :  { %1687 = vmatprep.subr.bf16.mxu0 %v2138_v46 }
  0x5f   :  { %1689 = vmatpush3.bf16.msra.mxu0 %v2138_v46 }
  0x60   :  { %1691 = vmatprep.subr.bf16.mxu0 %v2148_v51 }
  0x63   :  { %1693 = vmatpush3.bf16.msra.mxu0 %v2148_v51 }
 0x121   :  { %v1325_v53 = vpop.f32.mrb[0].mxu0 }
 0x122   :  { %v368_v55 = vadd.f32 %v1325_v53, %v1059_v52  ;;  %v331_v56 = vpop.f32.mrb[1].mxu0 }
 0x124   :  { %v374_v58 = vmax.f32 %v368_v55, 0.0 }
 0x125   :  { %v1328_v59 = vpop.f32.mrb[2].mxu0 }
 0x126   :  { %380 = vst [vmem:[#allocation3 + $0x10] sm:$0xff] %v374_v58  ;;  %v341_v60 = vpop.f32.mrb[3].mxu0  ;;  %1364 = vmatprep.mubr.f32.mxu1 %v374_v58 }
 0x127   :  { %v369_v63 = vadd.f32 %v1059_v52, %v341_v60 }
 0x129   :  { %v375_v0 = vmax.f32 %v369_v63, 0.0  ;;  %v1331_v1 = vpop.f32.mrb[4].mxu0 }
 0x12a   :  { %v2164_v3 = vadd.f32 %v1331_v1, %v1059_v52  ;;  %v351_v4 = vpop.f32.mrb[5].mxu0 }
 0x12b   :  { %381 = vst [vmem:[#allocation3 + $0x18] sm:$0xff] %v375_v0  ;;  %v371_v7 = vadd.f32 %v1059_v52, %v351_v4  ;;  %1365 = vmatmul.mubr.f32.vlgmr.msra.gmra.mrb[0].mxu1 %v375_v0 }
 0x12c   :  { %v378_v8 = vmax.f32 %v2164_v3, 0.0  ;;  %1641 = vmatpush3.bf16.msra.mxu1 %v2090_v29 }
 0x12d   :  { %v377_v9 = vmax.f32 %v371_v7, 0.0  ;;  %v387_v10 = vld [vmem:[#allocation3 + $0xe] sm:$0xff]  ;;  %1643 = vmatprep.subr.bf16.mxu1 %v2162_v2 }
 0x12e   :  { %384 = vst [vmem:[#allocation3 + $0x30] sm:$0xff] %v378_v8  ;;  %1399 = vmatprep.mubr.f32.mxu1 %v387_v10 }
 0x12f   :  { %383 = vst [vmem:[#allocation3 + $0x28] sm:$0xff] %v377_v9 }
 0x130   :  { %1645 = vmatpush3.bf16.msra.mxu1 %v2162_v2 }
 0x131   :  { %1647 = vmatprep.subr.bf16.mxu1 %v1646_v11 }
 0x132   :  { %v388_v37 = vld [vmem:[#allocation3 + $0x16] sm:$0xff] }
 0x134   :  { %1649 = vmatpush3.bf16.msra.mxu1 %v1646_v11 }
 0x135   :  { %1651 = vmatprep.subr.bf16.mxu1 %v1650_v14 }
 0x138   :  { %1653 = vmatpush3.bf16.msra.mxu1 %v1650_v14 }
 0x139   :  { %1655 = vmatprep.subr.bf16.mxu1 %v1654_v19 }
 0x13c   :  { %1657 = vmatpush3.bf16.msra.mxu1 %v1654_v19 }
 0x13d   :  { %1659 = vmatprep.subr.bf16.mxu1 %v1658_v23 }
 0x140   :  { %1661 = vmatpush3.bf16.msra.mxu1 %v1658_v23 }
 0x141   :  { %1663 = vmatprep.subr.bf16.mxu1 %v1662_v30 }
 0x144   :  { %1665 = vmatpush3.bf16.msra.mxu1 %v1662_v30 }
 0x145   :  { %1667 = vmatprep.subr.bf16.mxu1 %v1666_v35 }
 0x148   :  { %1669 = vmatpush3.bf16.msra.mxu1 %v1666_v35 }
 0x149   :  { %1703 = vmatprep.subr.bf16.mxu1 %v1944_v27 }
 0x14b   :  { %1400 = vmatmul.mubr.f32.vlgmr.msra.gmra.mrb[0].mxu1 %v388_v37 }
 0x14c   :  { %1705 = vmatpush3.bf16.msra.mxu1 %v1944_v27  ;;  %1469 = vmatprep.mubr.f32.mxu1 %v377_v9  ;;  %v691_v27 = vld [vmem:[#allocation3 + $0x26] sm:$0xff] }
 0x14d   :  { %1707 = vmatprep.subr.bf16.mxu1 %v1946_v28 }
 0x150   :  { %1709 = vmatpush3.bf16.msra.mxu1 %v1946_v28  ;;  %v692_v28 = vld [vmem:[#allocation3 + $0x2e] sm:$0xff] }
 0x151   :  { %1711 = vmatprep.subr.bf16.mxu1 %v1963_v34 }
 0x154   :  { %1713 = vmatpush3.bf16.msra.mxu1 %v1963_v34  ;;  %v603_v34 = vld [vmem:[%s2277_s5 + $0x60] sm:$0xff] }
 0x155   :  { %1715 = vmatprep.subr.bf16.mxu1 %v1979_v40 }
 0x158   :  { %1717 = vmatpush3.bf16.msra.mxu1 %v1979_v40  ;;  %v604_v40 = vld [vmem:[%s2277_s5 + $0x68] sm:$0xff] }
 0x159   :  { %1719 = vmatprep.subr.bf16.mxu1 %v2050_v15 }
 0x15c   :  { %1721 = vmatpush3.bf16.msra.mxu1 %v2050_v15  ;;  %v1694_v15 = vpack.c.bf16 %v604_v40, %v603_v34 }
 0x15d   :  { %1723 = vmatprep.subr.bf16.mxu1 %v2060_v18 }
 0x15e   :  { %1695 = vmatprep.subr.bf16.mxu0 %v1694_v15 }
 0x15f   :  { %1697 = vmatpush3.bf16.msra.mxu0 %v1694_v15 }
 0x160   :  { %1725 = vmatpush3.bf16.msra.mxu1 %v2060_v18  ;;  %v605_v18 = vld [vmem:[%s2277_s5 + $0x70] sm:$0xff] }
 0x161   :  { %1727 = vmatprep.subr.bf16.mxu1 %v2070_v21 }
 0x164   :  { %1729 = vmatpush3.bf16.msra.mxu1 %v2070_v21  ;;  %v606_v21 = vld [vmem:[%s2277_s5 + $0x78] sm:$0xff] }
 0x165   :  { %1731 = vmatprep.subr.bf16.mxu1 %v2080_v24 }
 0x168   :  { %1733 = vmatpush3.bf16.msra.mxu1 %v2080_v24  ;;  %v1698_v24 = vpack.c.bf16 %v606_v21, %v605_v18 }
 0x169   :  { %1735 = vmatprep.subr.bf16.mxu1 %v2090_v29 }
 0x16a   :  { %1699 = vmatprep.subr.bf16.mxu0 %v1698_v24 }
 0x16b   :  { %1470 = vmatmul.mubr.f32.vlgmr.msra.gmra.mrb[2].mxu1 %v378_v8  ;;  %1701 = vmatpush3.bf16.msra.mxu0 %v1698_v24 }
 0x16c   :  { %1737 = vmatpush3.bf16.msra.mxu1 %v2090_v29  ;;  %1504 = vmatprep.mubr.f32.mxu1 %v691_v27  ;;  %v1076_v29 = vld [vmem:[%s2276_s4] ss:$0 sm:$0xff] }
 0x16d   :  { %1739 = vmatprep.subr.bf16.mxu1 %v2162_v2  ;;  %1767 = vmatprep.subr.bf16.mxu0 %v2102_v33 }
 0x170   :  { %1741 = vmatpush3.bf16.msra.mxu1 %v2162_v2 }
 0x171   :  { %1743 = vmatprep.subr.bf16.mxu1 %v1646_v11 }
 0x174   :  { %1745 = vmatpush3.bf16.msra.mxu1 %v1646_v11 }
 0x175   :  { %1747 = vmatprep.subr.bf16.mxu1 %v1650_v14 }
 0x178   :  { %1749 = vmatpush3.bf16.msra.mxu1 %v1650_v14 }
 0x179   :  { %1751 = vmatprep.subr.bf16.mxu1 %v1654_v19 }
 0x17c   :  { %1753 = vmatpush3.bf16.msra.mxu1 %v1654_v19 }
 0x17d   :  { %1755 = vmatprep.subr.bf16.mxu1 %v1658_v23 }
 0x180   :  { %1757 = vmatpush3.bf16.msra.mxu1 %v1658_v23 }
 0x181   :  { %1759 = vmatprep.subr.bf16.mxu1 %v1662_v30 }
 0x184   :  { %1761 = vmatpush3.bf16.msra.mxu1 %v1662_v30 }
 0x185   :  { %1763 = vmatprep.subr.bf16.mxu1 %v1666_v35 }
 0x188   :  { %1765 = vmatpush3.bf16.msra.mxu1 %v1666_v35 }
 0x18b   :  { %1505 = vmatmul.mubr.f32.vlgmr.msra.gmra.mrb[2].mxu1 %v692_v28 }
 0x21e   :  { %v1401_v38 = vpop.f32.mrb[0].mxu1 }
 0x21f   :  { %v582_v41 = vadd.f32 %v1401_v38, %v1076_v29  ;;  %v565_v42 = vpop.f32.mrb[1].mxu1 }
 0x220   :  { %v581_v44 = vadd.f32 %v1076_v29, %v565_v42 }
 0x221   :  { %v584_v45 = vmax.f32 %v582_v41, 0.0 }
 0x222   :  { %v583_v48 = vmax.f32 %v581_v44, 0.0 }
 0x223   :  { %v588_v50 = vadd.f32 %v584_v45, %v1998_v49 }
 0x224   :  { %v587_v52 = vadd.f32 %v583_v48, %v1996_v47 }
 0x225   :  { %v590_v55 = vmax.f32 %v588_v50, 0.0 }
 0x226   :  { %v589_v53 = vmax.f32 %v587_v52, 0.0 }
 0x228   :  { %1434 = vmatprep.mubr.f32.mxu0 %v589_v53 }
 0x229   :  { %1435 = vmatmul.mubr.f32.vlgmr.msra.gmra.mrb[6].mxu0 %v590_v55 }
 0x22a   :  { %1769 = vmatpush3.bf16.msra.mxu0 %v2102_v33 }
 0x22b   :  { %1771 = vmatprep.subr.bf16.mxu0 %v2107_v36 }
 0x22e   :  { %1773 = vmatpush3.bf16.msra.mxu0 %v2107_v36 }
 0x22f   :  { %1775 = vmatprep.subr.bf16.mxu0 %v2118_v39 }
 0x232   :  { %1777 = vmatpush3.bf16.msra.mxu0 %v2118_v39 }
 0x233   :  { %1779 = vmatprep.subr.bf16.mxu0 %v2128_v43 }
 0x236   :  { %1781 = vmatpush3.bf16.msra.mxu0 %v2128_v43 }
 0x237   :  { %1783 = vmatprep.subr.bf16.mxu0 %v2138_v46 }
 0x23a   :  { %1785 = vmatpush3.bf16.msra.mxu0 %v2138_v46 }
 0x23b   :  { %1787 = vmatprep.subr.bf16.mxu0 %v2148_v51 }
 0x23e   :  { %1789 = vmatpush3.bf16.msra.mxu0 %v2148_v51  ;;  %v1077_v51 = vld [vmem:[%s2278_s6] ss:$0 sm:$0xff] }
 0x23f   :  { %1791 = vmatprep.subr.bf16.mxu0 %v1694_v15 }
 0x242   :  { %1793 = vmatpush3.bf16.msra.mxu0 %v1694_v15 }
 0x243   :  { %1795 = vmatprep.subr.bf16.mxu0 %v1698_v24 }
 0x246   :  { %1797 = vmatpush3.bf16.msra.mxu0 %v1698_v24 }
 0x25e   :  { %v1506_v47 = vpop.f32.mrb[2].mxu1 }
 0x25f   :  { %v885_v49 = vadd.f32 %v1506_v47, %v1076_v29  ;;  %v868_v33 = vpop.f32.mrb[3].mxu1 }
 0x260   :  { %v884_v36 = vadd.f32 %v1076_v29, %v868_v33 }
 0x261   :  { %v887_v39 = vmax.f32 %v885_v49, 0.0 }
 0x262   :  { %v886_v56 = vmax.f32 %v884_v36, 0.0 }
 0x263   :  { %v891_v43 = vadd.f32 %v887_v39, %v2017_v57 }
 0x264   :  { %v890_v58 = vadd.f32 %v886_v56, %v2008_v54 }
 0x265   :  { %v893_v46 = vmax.f32 %v891_v43, 0.0 }
 0x266   :  { %v892_v59 = vmax.f32 %v890_v58, 0.0 }
 0x268   :  { %1539 = vmatprep.mubr.f32.mxu0 %v892_v59 }
 0x269   :  { %1540 = vmatmul.mubr.f32.vlgmr.msra.gmra.mrb[8].mxu0 %v893_v46 }
 0x2fc   :  { %v1436_v60 = vpop.f32.mrb[6].mxu0 }
 0x2fd   :  { %v686_v61 = vadd.f32 %v1436_v60, %v1077_v51  ;;  %v680_v62 = vpop.f32.mrb[7].mxu0 }
 0x2fe   :  { %v681_v63 = vadd.f32 %v1077_v51, %v680_v62 }
 0x2ff   :  { %690 = vst [vmem:[#allocation5 + $0x8] sm:$0xff] %v686_v61 }
 0x300   :  { %689 = vst [vmem:[#allocation5] sm:$0xff] %v681_v63 }
 0x33c   :  { %v1541_v0 = vpop.f32.mrb[8].mxu0 }
 0x33d   :  { %v989_v57 = vadd.f32 %v1541_v0, %v1077_v51  ;;  %v983_v1 = vpop.f32.mrb[9].mxu0 }
 0x33e   :  { %v984_v54 = vadd.f32 %v1077_v51, %v983_v1 }
 0x33f   :  { %994 = vst [vmem:[#allocation5 + $0x18] sm:$0xff] %v989_v57 }
 0x340   :  { %993 = vst [vmem:[#allocation5 + $0x10] sm:$0xff] %v984_v54 }
 0x341   :  { %1823 = shalt.err (!%p1820_p4)
}
 0x342   :  { %s1824_s25 = scalar_lea.hbm %s2279_s7, 512 }
 0x343   :  { %p1825_p5 = scmp.ne.s32.totalorder %s2279_s7, %s1824_s25  ;;  %p1828_p6 = scmp.lt.u32.totalorder %s1824_s25, %s2279_s7 }
 0x345   :  { %p1830_p7 = pnand %p1828_p6, %p1825_p5 }
 0x347   :  { %1833 = shalt.err (!%p1830_p7)
}
 0x348   :  { %s1842_s30 = smov 128   ;;  %s1843_s8 = smov 8  }
 0x349   :  { %1006 = dma.vmem_to_hbm [thread:$0]  %s1001_s22, 512, %s2279_s7, [#allocation6], %s1842_s30, %s1842_s30, %s1843_s8  }
 0x34a   :  { %1838 = dma.done.wait [#allocation6], 512  }
 0x34b   :  { %1839 = vsyncadd [#allocation6], 4294966784 }
 0x34c   :  { %1010 = vsyncpa [#allocation6], 1 }
 0x34d   :  { %1011 = vsyncmov [#allocation4] }
 0x350   :  { %s1012_s11 = vpop.sfrf %1011 }
 0x351   :  { %p1096_p8 = scmp.ne.s32.totalorder %s1012_s11, 0 }
 0x353   :  { %1016 = shalt.err (%p1096_p8)  }
 0x354   :  { %1018 = vsyncmov [#allocation4 + $0x1] }
 0x357   :  { %s1019_s12 = vpop.sfrf %1018 }
 0x358   :  { %p1097_p9 = scmp.ne.s32.totalorder %s1019_s12, 0 }
 0x35a   :  { %1023 = shalt.err (%p1097_p9)  }

// kernel: tcn_forward.2
= control target key start
LH: loop header
LB: loop body
LE: loop exit
PB: predicated region body
PF: predicated region fallthrough
CT: control target
= control target key end

     0   :  { %12 = vsyncpa [#allocation6], 0  ;;  %s2061_s0 = inlined_call_operand.vmem [shape: f32[2,16,128], index: 0, kind: input, shape index: {}]   ;;  %s2062_s1 = inlined_call_operand.hbm [shape: f32[2,128,128], index: 1, kind: input, shape index: {}]   ;;  %s2063_s2 = inlined_call_operand.vmem [shape: f32[1,128], index: 2, kind: input, shape index: {}]   ;;  %s2064_s3 = inlined_call_operand.hbm [shape: f32[2,128,128], index: 3, kind: input, shape index: {}]   ;;  %s2065_s4 = inlined_call_operand.vmem [shape: f32[1,128], index: 4, kind: input, shape index: {}]   ;;  %s2066_s5 = inlined_call_operand.vmem [shape: f32[128,128], index: 5, kind: input, shape index: {}]   ;;  %s2067_s6 = inlined_call_operand.vmem [shape: f32[1,128], index: 6, kind: input, shape index: {}]   ;;  %s2068_s7 = inlined_call_operand.vmem [shape: f32[2,16,128], index: 7, kind: output, shape index: {}]  }
   0x1   :  { %13 = vsyncpa [#allocation8], 0  ;;  %s1836_s24 = smov [#allocation5]   ;;  %s1784_s28 = scalar_lea.hbm %s2062_s1, 4096 }
   0x2   :  { %s19_s25 = sshll.u32 %s1836_s24, 4  ;;  %p1785_p0 = scmp.ne.s32.totalorder %s2062_s1, %s1784_s28  ;;  %s20_s25 = int_to_ptr.vmem [resolvable:$true] %s19_s25 }
   0x3   :  { %p1788_p1 = scmp.lt.u32.totalorder %s1784_s28, %s2062_s1 }
   0x5   :  { %p1790_p2 = pnand %p1788_p1, %p1785_p0 }
   0x7   :  { %1793 = shalt.err (!%p1790_p2)
}
   0x8   :  { %s1794_s10 = scalar_lea.vmem %s20_s25, 4096  ;;  %p1799_p4 = scmp.lt.s32.totalorder %s20_s25, %s20_s25 }
   0x9   :  { %p1795_p3 = scmp.ne.s32.totalorder %s20_s25, %s1794_s10  ;;  %p1800_p5 = scmp.lt.s32.totalorder %s1794_s10, %s1794_s10 }
   0xb   :  { %p1801_p6 = por %p1800_p5, %p1799_p4 }
   0xd   :  { %p1802_p7 = pnand %p1801_p6, %p1795_p3 }
   0xf   :  { %1805 = shalt.err (!%p1802_p7)
}
  0x10   :  { %s1837_s11 = smov 128   ;;  %s1838_s12 = smov 8  }
  0x11   :  { %25 = dma.hbm_to_vmem [thread:$0]  %s2062_s1, 4096, %s20_s25, [#allocation6], %s1837_s11, %s1837_s11, %s1838_s12  }
  0x12   :  { %s1839_s15 = smov [#allocation7]   ;;  %s1806_s19 = scalar_lea.hbm %s2064_s3, 4096 }
  0x13   :  { %s33_s16 = sshll.u32 %s1839_s15, 4  ;;  %p1807_p8 = scmp.ne.s32.totalorder %s2064_s3, %s1806_s19  ;;  %s34_s16 = int_to_ptr.vmem [resolvable:$true] %s33_s16 }
  0x14   :  { %p1810_p9 = scmp.lt.u32.totalorder %s1806_s19, %s2064_s3 }
  0x16   :  { %p1812_p10 = pnand %p1810_p9, %p1807_p8 }
  0x18   :  { %1815 = shalt.err (!%p1812_p10)
}
  0x19   :  { %s1816_s24 = scalar_lea.vmem %s34_s16, 4096  ;;  %p1821_p12 = scmp.lt.s32.totalorder %s34_s16, %s34_s16 }
  0x1a   :  { %p1817_p11 = scmp.ne.s32.totalorder %s34_s16, %s1816_s24  ;;  %p1822_p13 = scmp.lt.s32.totalorder %s1816_s24, %s1816_s24 }
  0x1c   :  { %p1823_p0 = por %p1822_p13, %p1821_p12 }
  0x1e   :  { %p1824_p1 = pnand %p1823_p0, %p1817_p11 }
  0x20   :  { %1827 = shalt.err (!%p1824_p1)
}
  0x21   :  { %39 = dma.hbm_to_vmem [thread:$0]  %s2064_s3, 4096, %s34_s16, [#allocation8], %s1837_s11, %s1837_s11, %s1838_s12  }
  0x22   :  { %1828 = dma.done.wait [#allocation6], 4096  }
  0x23   :  { %1829 = vsyncadd [#allocation6], 4294963200 }
  0x24   :  { %1830 = dma.done.wait [#allocation8], 4096  }
  0x25   :  { %1831 = vsyncadd [#allocation8], 4294963200  ;;  %v85_v0 = vld [vmem:[%s2061_s0] sm:$0xff]  ;;  %v87_v1 = vld [vmem:[%s2061_s0 + $0x8] sm:$0xff] }
  0x26   :  { %86 = vst [vmem:[#allocation2 + $0x10] sm:$0xff] %v85_v0  ;;  %88 = vst [vmem:[#allocation2 + $0x18] sm:$0xff] %v87_v1 }
  0x27   :  { %96 = vsyncadd [#allocation4], 256  ;;  %v1057_v2 = vld [vmem:[%s2061_s0 + $0x10] sm:$0xff]  ;;  %v1058_v3 = vld [vmem:[%s2061_s0 + $0x18] sm:$0xff] }
  0x28   :  { %133 = vst [vmem:[#allocation2 + $0x28] sm:$0xff] %v1057_v2  ;;  %135 = vst [vmem:[#allocation2 + $0x30] sm:$0xff] %v1058_v3 }
  0x29   :  { %143 = vsyncadd [#allocation4 + $0x1], 256  ;;  %v1840_v4 = vmov 0.0  }
  0x2a   :  { %144 = vst [vmem:[#allocation2] sm:$0xff] %v1840_v4  ;;  %145 = vst [vmem:[#allocation2 + $0x8] sm:$0xff] %v1840_v4 }
  0x2b   :  { %146 = vst [vmem:[#allocation2 + $0x20] sm:$0xff] %v1840_v4 }
  0x2c   :  { %1832 = dma.done.wait [#allocation4], 256 }
  0x2d   :  { %1833 = vsyncadd [#allocation4], 4294967040 }
  0x2e   :  { %1834 = dma.done.wait [#allocation4 + $0x1], 256 }
  0x2f   :  { %1835 = vsyncadd [#allocation4 + $0x1], 4294967040  ;;  %412 = vst [vmem:[#allocation3 + $0x8] sm:$0xff] %v1840_v4  ;;  %v181_v5 = vld [vmem:[#allocation5 + $0x80] sm:$0xff]  ;;  %v182_v6 = vld [vmem:[#allocation5 + $0x88] sm:$0xff] }
  0x30   :  { %413 = vst [vmem:[#allocation3 + $0x20] sm:$0xff] %v1840_v4  ;;  %v183_v7 = vld [vmem:[#allocation5 + $0x90] sm:$0xff]  ;;  %v1513_v8 = vpack.c.bf16 %v182_v6, %v181_v5  ;;  %v184_v9 = vld [vmem:[#allocation5 + $0x98] sm:$0xff]  ;;  %v185_v11 = vld [vmem:[#allocation5 + $0xa0] sm:$0xff] }
  0x31   :  { %v1517_v10 = vpack.c.bf16 %v184_v9, %v183_v7  ;;  %v186_v12 = vld [vmem:[#allocation5 + $0xa8] sm:$0xff]  ;;  %v174_v14 = vld [vmem:[#allocation2 + $0x8] sm:$0xff]  ;;  %v187_v15 = vld [vmem:[#allocation5 + $0xb0] sm:$0xff] }
  0x32   :  { %1514 = vmatprep.subr.bf16.mxu0 %v1513_v8  ;;  %v1521_v13 = vpack.c.bf16 %v186_v12, %v185_v11  ;;  %v188_v16 = vld [vmem:[#allocation5 + $0xb8] sm:$0xff]  ;;  %1253 = vmatprep.mubr.f32.mxu0 %v174_v14  ;;  %v189_v18 = vld [vmem:[#allocation5 + $0xc0] sm:$0xff]  ;;  %v190_v19 = vld [vmem:[#allocation5 + $0xc8] sm:$0xff] }
  0x33   :  { %1516 = vmatpush3.bf16.msra.mxu0 %v1513_v8  ;;  %v1525_v17 = vpack.c.bf16 %v188_v16, %v187_v15  ;;  %v1529_v20 = vpack.c.bf16 %v190_v19, %v189_v18  ;;  %v191_v21 = vld [vmem:[#allocation5 + $0xd0] sm:$0xff]  ;;  %v192_v22 = vld [vmem:[#allocation5 + $0xd8] sm:$0xff]  ;;  %v435_v23 = vld [vmem:[#allocation7 + $0x80] sm:$0xff] }
  0x34   :  { %1518 = vmatprep.subr.bf16.mxu0 %v1517_v10  ;;  %v436_v24 = vld [vmem:[#allocation7 + $0x88] sm:$0xff]  ;;  %v437_v25 = vld [vmem:[#allocation7 + $0x90] sm:$0xff]  ;;  %v438_v26 = vld [vmem:[#allocation7 + $0x98] sm:$0xff]  ;;  %v1533_v29 = vpack.c.bf16 %v192_v22, %v191_v21 }
  0x35   :  { %v1917_v27 = vpack.c.bf16 %v436_v24, %v435_v23  ;;  %v1919_v28 = vpack.c.bf16 %v438_v26, %v437_v25  ;;  %v439_v30 = vld [vmem:[#allocation7 + $0xa0] sm:$0xff]  ;;  %v440_v31 = vld [vmem:[#allocation7 + $0xa8] sm:$0xff]  ;;  %v441_v36 = vld [vmem:[#allocation7 + $0xb0] sm:$0xff] }
  0x36   :  { %v193_v32 = vld [vmem:[#allocation5 + $0xe0] sm:$0xff]  ;;  %v194_v33 = vld [vmem:[#allocation5 + $0xe8] sm:$0xff]  ;;  %v1924_v34 = vpack.c.bf16 %v440_v31, %v439_v30  ;;  %v442_v37 = vld [vmem:[#allocation7 + $0xb8] sm:$0xff] }
  0x37   :  { %1520 = vmatpush3.bf16.msra.mxu0 %v1517_v10  ;;  %1578 = vmatprep.subr.bf16.mxu1 %v1917_v27  ;;  %v1537_v35 = vpack.c.bf16 %v194_v33, %v193_v32  ;;  %v195_v38 = vld [vmem:[#allocation5 + $0xf0] sm:$0xff]  ;;  %v196_v39 = vld [vmem:[#allocation5 + $0xf8] sm:$0xff]  ;;  %v1928_v40 = vpack.c.bf16 %v442_v37, %v441_v36  ;;  %v158_v42 = vld [vmem:[#allocation5] sm:$0xff] }
  0x38   :  { %1522 = vmatprep.subr.bf16.mxu0 %v1521_v13  ;;  %1580 = vmatpush3.bf16.msra.mxu1 %v1917_v27  ;;  %v1541_v41 = vpack.c.bf16 %v196_v39, %v195_v38  ;;  %v159_v43 = vld [vmem:[#allocation5 + $0x8] sm:$0xff]  ;;  %v160_v45 = vld [vmem:[#allocation5 + $0x10] sm:$0xff]  ;;  %v161_v46 = vld [vmem:[#allocation5 + $0x18] sm:$0xff] }
  0x39   :  { %1582 = vmatprep.subr.bf16.mxu1 %v1919_v28  ;;  %v1545_v44 = vpack.c.bf16 %v159_v43, %v158_v42  ;;  %v175_v47 = vld [vmem:[#allocation2 + $0x10] sm:$0xff]  ;;  %v1549_v48 = vpack.c.bf16 %v161_v46, %v160_v45  ;;  %v1933_v49 = vld [vmem:[#allocation2 + $0x18] sm:$0xff]  ;;  %v177_v52 = vld [vmem:[#allocation2 + $0x20] sm:$0xff] }
  0x3a   :  { %v162_v50 = vld [vmem:[#allocation5 + $0x20] sm:$0xff]  ;;  %v163_v51 = vld [vmem:[#allocation5 + $0x28] sm:$0xff]  ;;  %v1936_v54 = vld [vmem:[#allocation2 + $0x28] sm:$0xff] }
  0x3b   :  { %1524 = vmatpush3.bf16.msra.mxu0 %v1521_v13  ;;  %v1553_v53 = vpack.c.bf16 %v163_v51, %v162_v50  ;;  %v164_v55 = vld [vmem:[#allocation5 + $0x30] sm:$0xff]  ;;  %v165_v56 = vld [vmem:[#allocation5 + $0x38] sm:$0xff]  ;;  %v1939_v57 = vld [vmem:[#allocation2 + $0x30] sm:$0xff] }
  0x3c   :  { %1526 = vmatprep.subr.bf16.mxu0 %v1525_v17  ;;  %1584 = vmatpush3.bf16.msra.mxu1 %v1919_v28  ;;  %v1557_v58 = vpack.c.bf16 %v165_v56, %v164_v55  ;;  %v152_v59 = vld [vmem:[#allocation2 + $0x7] sm:$0xff]  ;;  %v166_v60 = vld [vmem:[#allocation5 + $0x40] sm:$0xff]  ;;  %v167_v61 = vld [vmem:[#allocation5 + $0x48] sm:$0xff] }
  0x3d   :  { %1586 = vmatprep.subr.bf16.mxu1 %v1924_v34  ;;  %v1561_v62 = vpack.c.bf16 %v167_v61, %v166_v60  ;;  %v168_v63 = vld [vmem:[#allocation5 + $0x50] sm:$0xff]  ;;  %v169_v0 = vld [vmem:[#allocation5 + $0x58] sm:$0xff]  ;;  %v170_v2 = vld [vmem:[#allocation5 + $0x60] sm:$0xff] }
  0x3e   :  { %v1565_v1 = vpack.c.bf16 %v169_v0, %v168_v63  ;;  %v171_v3 = vld [vmem:[#allocation5 + $0x68] sm:$0xff]  ;;  %v172_v5 = vld [vmem:[#allocation5 + $0x70] sm:$0xff]  ;;  %v173_v6 = vld [vmem:[#allocation5 + $0x78] sm:$0xff] }
  0x3f   :  { %1528 = vmatpush3.bf16.msra.mxu0 %v1525_v17  ;;  %v1569_v4 = vpack.c.bf16 %v171_v3, %v170_v2  ;;  %v1573_v7 = vpack.c.bf16 %v173_v6, %v172_v5  ;;  %v153_v8 = vld [vmem:[#allocation2 + $0xf] sm:$0xff]  ;;  %v154_v9 = vld [vmem:[#allocation2 + $0x17] sm:$0xff]  ;;  %v155_v10 = vld [vmem:[#allocation2 + $0x1f] sm:$0xff] }
  0x40   :  { %1530 = vmatprep.subr.bf16.mxu0 %v1529_v20  ;;  %1588 = vmatpush3.bf16.msra.mxu1 %v1924_v34  ;;  %v156_v11 = vld [vmem:[#allocation2 + $0x27] sm:$0xff]  ;;  %v157_v12 = vld [vmem:[#allocation2 + $0x2f] sm:$0xff]  ;;  %v444_v14 = vld [vmem:[#allocation7 + $0xc8] sm:$0xff] }
  0x41   :  { %1590 = vmatprep.subr.bf16.mxu1 %v1928_v40  ;;  %v443_v13 = vld [vmem:[#allocation7 + $0xc0] sm:$0xff]  ;;  %v445_v16 = vld [vmem:[#allocation7 + $0xd0] sm:$0xff]  ;;  %v446_v17 = vld [vmem:[#allocation7 + $0xd8] sm:$0xff] }
  0x42   :  { %v1942_v15 = vpack.c.bf16 %v444_v14, %v443_v13  ;;  %v1946_v18 = vpack.c.bf16 %v446_v17, %v445_v16  ;;  %v447_v19 = vld [vmem:[#allocation7 + $0xe0] sm:$0xff]  ;;  %v449_v22 = vld [vmem:[#allocation7 + $0xf0] sm:$0xff]  ;;  %v450_v23 = vld [vmem:[#allocation7 + $0xf8] sm:$0xff] }
  0x43   :  { %1532 = vmatpush3.bf16.msra.mxu0 %v1529_v20  ;;  %v448_v20 = vld [vmem:[#allocation7 + $0xe8] sm:$0xff]  ;;  %v1954_v24 = vpack.c.bf16 %v450_v23, %v449_v22  ;;  %v416_v25 = vld [vmem:[#allocation7] sm:$0xff]  ;;  %v614_v30 = vld [vmem:[%s2066_s5] sm:$0xff] }
  0x44   :  { %1534 = vmatprep.subr.bf16.mxu0 %v1533_v29  ;;  %1592 = vmatpush3.bf16.msra.mxu1 %v1928_v40  ;;  %v1950_v21 = vpack.c.bf16 %v448_v20, %v447_v19  ;;  %v417_v26 = vld [vmem:[#allocation7 + $0x8] sm:$0xff]  ;;  %v615_v31 = vld [vmem:[%s2066_s5 + $0x8] sm:$0xff]  ;;  %v616_v33 = vld [vmem:[%s2066_s5 + $0x10] sm:$0xff] }
  0x45   :  { %1594 = vmatprep.subr.bf16.mxu1 %v1942_v15  ;;  %v1641_v32 = vpack.c.bf16 %v615_v31, %v614_v30  ;;  %v618_v37 = vld [vmem:[%s2066_s5 + $0x20] sm:$0xff]  ;;  %v619_v38 = vld [vmem:[%s2066_s5 + $0x28] sm:$0xff]  ;;  %v621_v42 = vld [vmem:[%s2066_s5 + $0x38] sm:$0xff] }
  0x46   :  { %v1649_v39 = vpack.c.bf16 %v619_v38, %v618_v37  ;;  %v623_v45 = vld [vmem:[%s2066_s5 + $0x48] sm:$0xff]  ;;  %v626_v51 = vld [vmem:[%s2066_s5 + $0x60] sm:$0xff]  ;;  %v628_v55 = vld [vmem:[%s2066_s5 + $0x70] sm:$0xff] }
  0x47   :  { %1536 = vmatpush3.bf16.msra.mxu0 %v1533_v29  ;;  %v1958_v29 = vpack.c.bf16 %v417_v26, %v416_v25  ;;  %v629_v56 = vld [vmem:[%s2066_s5 + $0x78] sm:$0xff]  ;;  %v418_v0 = vld [vmem:[#allocation7 + $0x10] sm:$0xff]  ;;  %v423_v16 = vld [vmem:[#allocation7 + $0x38] sm:$0xff] }
  0x48   :  { %1538 = vmatprep.subr.bf16.mxu0 %v1537_v35  ;;  %1596 = vmatpush3.bf16.msra.mxu1 %v1942_v15  ;;  %v422_v14 = vld [vmem:[#allocation7 + $0x30] sm:$0xff]  ;;  %v424_v19 = vld [vmem:[#allocation7 + $0x40] sm:$0xff]  ;;  %v425_v20 = vld [vmem:[#allocation7 + $0x48] sm:$0xff] }
  0x49   :  { %1598 = vmatprep.subr.bf16.mxu1 %v1946_v18  ;;  %v1621_v17 = vpack.c.bf16 %v423_v16, %v422_v14  ;;  %v1625_v22 = vpack.c.bf16 %v425_v20, %v424_v19  ;;  %v426_v23 = vld [vmem:[#allocation7 + $0x50] sm:$0xff]  ;;  %v427_v25 = vld [vmem:[#allocation7 + $0x58] sm:$0xff]  ;;  %v428_v30 = vld [vmem:[#allocation7 + $0x60] sm:$0xff] }
  0x4a   :  { %v1629_v26 = vpack.c.bf16 %v427_v25, %v426_v23  ;;  %v429_v31 = vld [vmem:[#allocation7 + $0x68] sm:$0xff]  ;;  %v1061_v38 = vld [vmem:[%s2065_s4] ss:$0 sm:$0xff] }
  0x4b   :  { %1540 = vmatpush3.bf16.msra.mxu0 %v1537_v35  ;;  %v617_v35 = vld [vmem:[%s2066_s5 + $0x18] sm:$0xff] }
  0x4c   :  { %1542 = vmatprep.subr.bf16.mxu0 %v1541_v41  ;;  %1600 = vmatpush3.bf16.msra.mxu1 %v1946_v18  ;;  %v1645_v36 = vpack.c.bf16 %v617_v35, %v616_v33  ;;  %v430_v33 = vld [vmem:[#allocation7 + $0x70] sm:$0xff]  ;;  %v431_v35 = vld [vmem:[#allocation7 + $0x78] sm:$0xff] }
  0x4d   :  { %1602 = vmatprep.subr.bf16.mxu1 %v1950_v21 }
  0x4f   :  { %1544 = vmatpush3.bf16.msra.mxu0 %v1541_v41  ;;  %v620_v41 = vld [vmem:[%s2066_s5 + $0x30] sm:$0xff] }
  0x50   :  { %1546 = vmatprep.subr.bf16.mxu0 %v1545_v44  ;;  %1604 = vmatpush3.bf16.msra.mxu1 %v1950_v21  ;;  %v1653_v43 = vpack.c.bf16 %v621_v42, %v620_v41 }
  0x51   :  { %1606 = vmatprep.subr.bf16.mxu1 %v1954_v24 }
  0x52   :  { %1254 = vmatmul.mubr.f32.vlgmr.msra.gmra.mrb[0].mxu0 %v175_v47 }
  0x53   :  { %1548 = vmatpush3.bf16.msra.mxu0 %v1545_v44  ;;  %1256 = vmatprep.mubr.f32.mxu0 %v1933_v49  ;;  %v622_v44 = vld [vmem:[%s2066_s5 + $0x40] sm:$0xff] }
  0x54   :  { %1550 = vmatprep.subr.bf16.mxu0 %v1549_v48  ;;  %1608 = vmatpush3.bf16.msra.mxu1 %v1954_v24  ;;  %v1657_v46 = vpack.c.bf16 %v623_v45, %v622_v44 }
  0x55   :  { %1610 = vmatprep.subr.bf16.mxu1 %v1958_v29 }
  0x56   :  { %1257 = vmatmul.mubr.f32.gmra.mrb[2].mxu0 %v177_v52  ;;  %v627_v52 = vld [vmem:[%s2066_s5 + $0x68] sm:$0xff] }
  0x57   :  { %1552 = vmatpush3.bf16.msra.mxu0 %v1549_v48  ;;  %1259 = vmatprep.mubr.f32.mxu0 %v1936_v54  ;;  %v625_v48 = vld [vmem:[%s2066_s5 + $0x58] sm:$0xff] }
  0x58   :  { %1554 = vmatprep.subr.bf16.mxu0 %v1553_v53 }
  0x5a   :  { %1260 = vmatmul.mubr.f32.gmra.mrb[4].mxu0 %v1939_v57 }
  0x5b   :  { %1556 = vmatpush3.bf16.msra.mxu0 %v1553_v53  ;;  %1294 = vmatprep.mubr.f32.mxu0 %v152_v59  ;;  %v1665_v53 = vpack.c.bf16 %v627_v52, %v626_v51 }
  0x5c   :  { %1558 = vmatprep.subr.bf16.mxu0 %v1557_v58 }
  0x5f   :  { %1560 = vmatpush3.bf16.msra.mxu0 %v1557_v58  ;;  %v1669_v58 = vpack.c.bf16 %v629_v56, %v628_v55 }
  0x60   :  { %1562 = vmatprep.subr.bf16.mxu0 %v1561_v62 }
  0x63   :  { %1564 = vmatpush3.bf16.msra.mxu0 %v1561_v62 }
  0x64   :  { %1566 = vmatprep.subr.bf16.mxu0 %v1565_v1 }
  0x67   :  { %1568 = vmatpush3.bf16.msra.mxu0 %v1565_v1  ;;  %v419_v1 = vld [vmem:[#allocation7 + $0x18] sm:$0xff] }
  0x68   :  { %1570 = vmatprep.subr.bf16.mxu0 %v1569_v4  ;;  %v2015_v5 = vpack.c.bf16 %v419_v1, %v418_v0 }
  0x6b   :  { %1572 = vmatpush3.bf16.msra.mxu0 %v1569_v4 }
  0x6c   :  { %1574 = vmatprep.subr.bf16.mxu0 %v1573_v7 }
  0x6f   :  { %1576 = vmatpush3.bf16.msra.mxu0 %v1573_v7  ;;  %v420_v7 = vld [vmem:[#allocation7 + $0x20] sm:$0xff] }
  0x70   :  { %1642 = vmatprep.subr.bf16.mxu0 %v1641_v32 }
  0x72   :  { %1295 = vmatmul.mubr.f32.vlgmr.msra.gmra.mrb[0].mxu0 %v153_v8  ;;  %v421_v8 = vld [vmem:[#allocation7 + $0x28] sm:$0xff] }
  0x73   :  { %1297 = vmatprep.mubr.f32.mxu0 %v154_v9  ;;  %1644 = vmatpush3.bf16.msra.mxu0 %v1641_v32  ;;  %v1617_v13 = vpack.c.bf16 %v421_v8, %v420_v7 }
  0x74   :  { %1646 = vmatprep.subr.bf16.mxu0 %v1645_v36 }
  0x76   :  { %1298 = vmatmul.mubr.f32.gmra.mrb[2].mxu0 %v155_v10 }
  0x77   :  { %1300 = vmatprep.mubr.f32.mxu0 %v156_v11  ;;  %1648 = vmatpush3.bf16.msra.mxu0 %v1645_v36 }
  0x78   :  { %1650 = vmatprep.subr.bf16.mxu0 %v1649_v39 }
  0x7a   :  { %1301 = vmatmul.mubr.f32.gmra.mrb[4].mxu0 %v157_v12 }
  0x7b   :  { %1405 = vmatprep.mubr.f32.mxu0 %v175_v47  ;;  %1652 = vmatpush3.bf16.msra.mxu0 %v1649_v39  ;;  %v624_v47 = vld [vmem:[%s2066_s5 + $0x50] sm:$0xff] }
  0x7c   :  { %1654 = vmatprep.subr.bf16.mxu0 %v1653_v43  ;;  %v1661_v50 = vpack.c.bf16 %v625_v48, %v624_v47 }
  0x7f   :  { %1656 = vmatpush3.bf16.msra.mxu0 %v1653_v43 }
  0x80   :  { %1658 = vmatprep.subr.bf16.mxu0 %v1657_v46 }
  0x83   :  { %1660 = vmatpush3.bf16.msra.mxu0 %v1657_v46 }
  0x84   :  { %1662 = vmatprep.subr.bf16.mxu0 %v1661_v50 }
  0x87   :  { %1664 = vmatpush3.bf16.msra.mxu0 %v1661_v50 }
  0x88   :  { %1666 = vmatprep.subr.bf16.mxu0 %v1665_v53 }
  0x8b   :  { %1668 = vmatpush3.bf16.msra.mxu0 %v1665_v53 }
  0x8c   :  { %1670 = vmatprep.subr.bf16.mxu0 %v1669_v58 }
  0x8f   :  { %1672 = vmatpush3.bf16.msra.mxu0 %v1669_v58 }
  0x90   :  { %1738 = vmatprep.subr.bf16.mxu0 %v1641_v32 }
  0x92   :  { %1406 = vmatmul.mubr.f32.vlgmr.msra.gmra.mrb[6].mxu0 %v1933_v49  ;;  %v1060_v49 = vld [vmem:[%s2063_s2] ss:$0 sm:$0xff] }
  0x93   :  { %1740 = vmatpush3.bf16.msra.mxu0 %v1641_v32  ;;  %1510 = vmatprep.mubr.f32.mxu0 %v1936_v54  ;;  %v1633_v32 = vpack.c.bf16 %v429_v31, %v428_v30 }
  0x94   :  { %1742 = vmatprep.subr.bf16.mxu0 %v1645_v36 }
  0x97   :  { %1744 = vmatpush3.bf16.msra.mxu0 %v1645_v36  ;;  %v1637_v36 = vpack.c.bf16 %v431_v35, %v430_v33 }
  0x98   :  { %1746 = vmatprep.subr.bf16.mxu0 %v1649_v39 }
  0x9b   :  { %1748 = vmatpush3.bf16.msra.mxu0 %v1649_v39 }
  0x9c   :  { %1750 = vmatprep.subr.bf16.mxu0 %v1653_v43 }
  0x9f   :  { %1752 = vmatpush3.bf16.msra.mxu0 %v1653_v43 }
  0xa0   :  { %1754 = vmatprep.subr.bf16.mxu0 %v1657_v46 }
  0xa3   :  { %1756 = vmatpush3.bf16.msra.mxu0 %v1657_v46 }
  0xa4   :  { %1758 = vmatprep.subr.bf16.mxu0 %v1661_v50 }
  0xa7   :  { %1760 = vmatpush3.bf16.msra.mxu0 %v1661_v50 }
  0xa8   :  { %1762 = vmatprep.subr.bf16.mxu0 %v1665_v53 }
  0xab   :  { %1764 = vmatpush3.bf16.msra.mxu0 %v1665_v53 }
  0xac   :  { %1766 = vmatprep.subr.bf16.mxu0 %v1669_v58 }
  0xaf   :  { %1768 = vmatpush3.bf16.msra.mxu0 %v1669_v58 }
  0xb2   :  { %1511 = vmatmul.mubr.f32.vlgmr.msra.gmra.mrb[8].mxu0 %v1939_v57 }
 0x145   :  { %v1296_v54 = vpop.f32.mrb[0].mxu0 }
 0x146   :  { %v395_v59 = vadd.f32 %v1296_v54, %v1060_v49  ;;  %v358_v60 = vpop.f32.mrb[1].mxu0 }
 0x148   :  { %v401_v61 = vmax.f32 %v395_v59, 0.0 }
 0x149   :  { %v1299_v62 = vpop.f32.mrb[2].mxu0 }
 0x14a   :  { %407 = vst [vmem:[#allocation3 + $0x10] sm:$0xff] %v401_v61  ;;  %v368_v63 = vpop.f32.mrb[3].mxu0  ;;  %1335 = vmatprep.mubr.f32.mxu1 %v401_v61 }
 0x14b   :  { %v396_v2 = vadd.f32 %v1060_v49, %v368_v63 }
 0x14d   :  { %v402_v3 = vmax.f32 %v396_v2, 0.0  ;;  %v1302_v4 = vpop.f32.mrb[4].mxu0 }
 0x14e   :  { %v2017_v57 = vadd.f32 %v1302_v4, %v1060_v49  ;;  %v378_v6 = vpop.f32.mrb[5].mxu0 }
 0x14f   :  { %408 = vst [vmem:[#allocation3 + $0x18] sm:$0xff] %v402_v3  ;;  %v398_v9 = vadd.f32 %v1060_v49, %v378_v6  ;;  %1336 = vmatmul.mubr.f32.vlgmr.msra.gmra.mrb[0].mxu1 %v402_v3 }
 0x150   :  { %v405_v10 = vmax.f32 %v2017_v57, 0.0  ;;  %1612 = vmatpush3.bf16.msra.mxu1 %v1958_v29 }
 0x151   :  { %v404_v11 = vmax.f32 %v398_v9, 0.0  ;;  %v414_v12 = vld [vmem:[#allocation3 + $0xf] sm:$0xff]  ;;  %1614 = vmatprep.subr.bf16.mxu1 %v2015_v5 }
 0x152   :  { %411 = vst [vmem:[#allocation3 + $0x30] sm:$0xff] %v405_v10  ;;  %1370 = vmatprep.mubr.f32.mxu1 %v414_v12 }
 0x153   :  { %410 = vst [vmem:[#allocation3 + $0x28] sm:$0xff] %v404_v11 }
 0x154   :  { %1616 = vmatpush3.bf16.msra.mxu1 %v2015_v5 }
 0x155   :  { %1618 = vmatprep.subr.bf16.mxu1 %v1617_v13 }
 0x156   :  { %v415_v37 = vld [vmem:[#allocation3 + $0x17] sm:$0xff] }
 0x158   :  { %1620 = vmatpush3.bf16.msra.mxu1 %v1617_v13 }
 0x159   :  { %1622 = vmatprep.subr.bf16.mxu1 %v1621_v17 }
 0x15c   :  { %1624 = vmatpush3.bf16.msra.mxu1 %v1621_v17 }
 0x15d   :  { %1626 = vmatprep.subr.bf16.mxu1 %v1625_v22 }
 0x160   :  { %1628 = vmatpush3.bf16.msra.mxu1 %v1625_v22 }
 0x161   :  { %1630 = vmatprep.subr.bf16.mxu1 %v1629_v26 }
 0x164   :  { %1632 = vmatpush3.bf16.msra.mxu1 %v1629_v26 }
 0x165   :  { %1634 = vmatprep.subr.bf16.mxu1 %v1633_v32 }
 0x168   :  { %1636 = vmatpush3.bf16.msra.mxu1 %v1633_v32 }
 0x169   :  { %1638 = vmatprep.subr.bf16.mxu1 %v1637_v36 }
 0x16c   :  { %1640 = vmatpush3.bf16.msra.mxu1 %v1637_v36 }
 0x16d   :  { %1674 = vmatprep.subr.bf16.mxu1 %v1917_v27 }
 0x16f   :  { %1371 = vmatmul.mubr.f32.vlgmr.msra.gmra.mrb[0].mxu1 %v415_v37 }
 0x170   :  { %1676 = vmatpush3.bf16.msra.mxu1 %v1917_v27  ;;  %1440 = vmatprep.mubr.f32.mxu1 %v404_v11  ;;  %v718_v27 = vld [vmem:[#allocation3 + $0x27] sm:$0xff] }
 0x171   :  { %1678 = vmatprep.subr.bf16.mxu1 %v1919_v28 }
 0x174   :  { %1680 = vmatpush3.bf16.msra.mxu1 %v1919_v28  ;;  %v719_v28 = vld [vmem:[#allocation3 + $0x2f] sm:$0xff] }
 0x175   :  { %1682 = vmatprep.subr.bf16.mxu1 %v1924_v34 }
 0x178   :  { %1684 = vmatpush3.bf16.msra.mxu1 %v1924_v34  ;;  %v1407_v34 = vpop.f32.mrb[6].mxu0 }
 0x179   :  { %1686 = vmatprep.subr.bf16.mxu1 %v1928_v40 }
 0x17c   :  { %1688 = vmatpush3.bf16.msra.mxu1 %v1928_v40  ;;  %v703_v40 = vpop.f32.mrb[7].mxu0 }
 0x17d   :  { %1690 = vmatprep.subr.bf16.mxu1 %v1942_v15 }
 0x180   :  { %1692 = vmatpush3.bf16.msra.mxu1 %v1942_v15 }
 0x181   :  { %1694 = vmatprep.subr.bf16.mxu1 %v1946_v18 }
 0x184   :  { %1696 = vmatpush3.bf16.msra.mxu1 %v1946_v18  ;;  %v1062_v18 = vld [vmem:[%s2067_s6] ss:$0 sm:$0xff] }
 0x185   :  { %1698 = vmatprep.subr.bf16.mxu1 %v1950_v21  ;;  %v1512_v15 = vpop.f32.mrb[8].mxu0  ;;  %v709_v43 = vadd.f32 %v1407_v34, %v1062_v18  ;;  %v704_v45 = vadd.f32 %v1062_v18, %v703_v40 }
 0x188   :  { %1700 = vmatpush3.bf16.msra.mxu1 %v1950_v21  ;;  %v1006_v21 = vpop.f32.mrb[9].mxu0 }
 0x189   :  { %1702 = vmatprep.subr.bf16.mxu1 %v1954_v24 }
 0x18c   :  { %1704 = vmatpush3.bf16.msra.mxu1 %v1954_v24  ;;  %v1012_v24 = vadd.f32 %v1512_v15, %v1062_v18 }
 0x18d   :  { %1706 = vmatprep.subr.bf16.mxu1 %v1958_v29 }
 0x18f   :  { %1441 = vmatmul.mubr.f32.vlgmr.msra.gmra.mrb[2].mxu1 %v405_v10 }
 0x190   :  { %1708 = vmatpush3.bf16.msra.mxu1 %v1958_v29  ;;  %1475 = vmatprep.mubr.f32.mxu1 %v718_v27  ;;  %v1007_v29 = vadd.f32 %v1062_v18, %v1006_v21 }
 0x191   :  { %1710 = vmatprep.subr.bf16.mxu1 %v2015_v5 }
 0x194   :  { %1712 = vmatpush3.bf16.msra.mxu1 %v2015_v5 }
 0x195   :  { %1714 = vmatprep.subr.bf16.mxu1 %v1617_v13 }
 0x198   :  { %1716 = vmatpush3.bf16.msra.mxu1 %v1617_v13 }
 0x199   :  { %1718 = vmatprep.subr.bf16.mxu1 %v1621_v17 }
 0x19c   :  { %1720 = vmatpush3.bf16.msra.mxu1 %v1621_v17 }
 0x19d   :  { %1722 = vmatprep.subr.bf16.mxu1 %v1625_v22 }
 0x1a0   :  { %1724 = vmatpush3.bf16.msra.mxu1 %v1625_v22 }
 0x1a1   :  { %1726 = vmatprep.subr.bf16.mxu1 %v1629_v26 }
 0x1a4   :  { %1728 = vmatpush3.bf16.msra.mxu1 %v1629_v26 }
 0x1a5   :  { %1730 = vmatprep.subr.bf16.mxu1 %v1633_v32 }
 0x1a8   :  { %1732 = vmatpush3.bf16.msra.mxu1 %v1633_v32 }
 0x1a9   :  { %1734 = vmatprep.subr.bf16.mxu1 %v1637_v36 }
 0x1ac   :  { %1736 = vmatpush3.bf16.msra.mxu1 %v1637_v36 }
 0x1af   :  { %1476 = vmatmul.mubr.f32.vlgmr.msra.gmra.mrb[2].mxu1 %v719_v28 }
 0x242   :  { %v1372_v39 = vpop.f32.mrb[0].mxu1 }
 0x243   :  { %v609_v41 = vadd.f32 %v1372_v39, %v1061_v38  ;;  %v592_v42 = vpop.f32.mrb[1].mxu1 }
 0x244   :  { %v608_v44 = vadd.f32 %v1061_v38, %v592_v42 }
 0x245   :  { %v611_v46 = vmax.f32 %v609_v41, 0.0 }
 0x246   :  { %v610_v47 = vmax.f32 %v608_v44, 0.0 }
 0x247   :  { %v713_v48 = vadd.f32 %v709_v43, %v611_v46 }
 0x248   :  { %v712_v50 = vadd.f32 %v704_v45, %v610_v47 }
 0x249   :  { %v715_v51 = vmax.f32 %v713_v48, 0.0 }
 0x24a   :  { %v714_v52 = vmax.f32 %v712_v50, 0.0 }
 0x24b   :  { %717 = vst [vmem:[%s2068_s7 + $0x8] sm:$0xff] %v715_v51 }
 0x24c   :  { %716 = vst [vmem:[%s2068_s7] sm:$0xff] %v714_v52 }
 0x282   :  { %v1477_v53 = vpop.f32.mrb[2].mxu1 }
 0x283   :  { %v912_v55 = vadd.f32 %v1477_v53, %v1061_v38  ;;  %v895_v56 = vpop.f32.mrb[3].mxu1 }
 0x284   :  { %v911_v58 = vadd.f32 %v1061_v38, %v895_v56 }
 0x285   :  { %v914_v49 = vmax.f32 %v912_v55, 0.0 }
 0x286   :  { %v913_v54 = vmax.f32 %v911_v58, 0.0 }
 0x287   :  { %v1016_v59 = vadd.f32 %v1012_v24, %v914_v49 }
 0x288   :  { %v1015_v60 = vadd.f32 %v1007_v29, %v913_v54 }
 0x289   :  { %v1018_v61 = vmax.f32 %v1016_v59, 0.0 }
 0x28a   :  { %v1017_v62 = vmax.f32 %v1015_v60, 0.0 }
 0x28b   :  { %1066 = vst [vmem:[%s2068_s7 + $0x18] sm:$0xff] %v1018_v61 }
 0x28c   :  { %1065 = vst [vmem:[%s2068_s7 + $0x10] sm:$0xff] %v1017_v62 }
 0x28d   :  { %1026 = vsyncpa [#allocation6], 1 }
 0x28e   :  { %1027 = vsyncpa [#allocation8], 1 }
 0x28f   :  { %1028 = vsyncmov [#allocation4] }
 0x292   :  { %s1029_s1 = vpop.sfrf %1028 }
 0x293   :  { %p1067_p2 = scmp.ne.s32.totalorder %s1029_s1, 0 }
 0x295   :  { %1033 = shalt.err (%p1067_p2)  }
 0x296   :  { %1035 = vsyncmov [#allocation4 + $0x1] }
 0x299   :  { %s1036_s25 = vpop.sfrf %1035 }
 0x29a   :  { %p1068_p3 = scmp.ne.s32.totalorder %s1036_s25, 0 }
 0x29c   :  { %1040 = shalt.err (%p1068_p3)  }

</bundles_post_ra>
